<compile_context>
chip_gen: v6e
topology: v6e:2x2x1
jax: 0.10.0
libtpu: 0.0.40
codegen_flags: <defaults>
</compile_context>

<pallas_src>
import functools

import jax
import jax.numpy as jnp
import numpy as np
from jax.experimental import pallas as pl
from jax.experimental.pallas import tpu as pltpu

_COMPUTE_DTYPE = jnp.bfloat16          # MXU input / inter-layer activation dtype
_ACC_DTYPE = jnp.float32               # accumulator / BN math dtype

# Tile targets.  Good defaults for v6e; sweep per generation:
#   v5e : TN=128 (4x128x128 MXUs), TM up to 512
#   v6e : TM=512, TN=256
#   v7x : TM=256, TN=256 (64 MiB VMEM per TensorCore)
_TM_TARGET = 512
_TN_TARGET = 256
_TK_TARGET = 512
_VMEM_LIMIT = 64 * 1024 * 1024


def _cdiv(a, b):
    return -(-a // b)


def _pick_mn_tile(dim, target):
    # block dim == full array dim is always legal; otherwise use the aligned target
    # (ragged trailing M/N blocks are safe: masked output writes, row/col independence).
    return dim if dim <= target else target


def _pick_k_tile(k, target=_TK_TARGET):
    # K tiles must divide K exactly (garbage in a padded K block would corrupt the sum).
    if k <= target:
        return k
    for tk in (target, 256, 128):
        if k % tk == 0:
            return tk
    return k   # rare non-128-aligned large K: single full-K block


# ----------------------------------------------------------------------------------------
# Kernel 1: K-tiled fused matmul  out = act((X @ W) * scale + bias [+ residual])
#   grid = (M tiles, N tiles, K tiles)  — K last, "arbitrary", f32 VMEM accumulator.
# ----------------------------------------------------------------------------------------
def _matmul_kernel(x_ref, w_ref, s_ref, b_ref, *rest, relu, has_res):
    if has_res:
        res_ref, o_ref, acc_ref = rest
    else:
        o_ref, acc_ref = rest

    @pl.when(pl.program_id(2) == 0)
    def _init():
        acc_ref[...] = jnp.zeros_like(acc_ref)

    acc_ref[...] += jnp.dot(x_ref[...], w_ref[...],
                            preferred_element_type=jnp.float32)

    @pl.when(pl.program_id(2) == pl.num_programs(2) - 1)
    def _finalize():
        y = acc_ref[...] * s_ref[...] + b_ref[...]
        if has_res:
            y = y + res_ref[...].astype(jnp.float32)
        if relu:
            y = jnp.maximum(y, 0.0)
        o_ref[...] = y.astype(o_ref.dtype)


def fused_matmul_bn(X, Wm, scale, bias, res2d=None, relu=False,
                    out_dtype=_COMPUTE_DTYPE):
    """act((X @ Wm) * scale + bias [+ res2d]) via one Pallas kernel (bf16 MXU, f32 acc)."""
    M, K = X.shape
    _, N = Wm.shape
    TM = _pick_mn_tile(M, _TM_TARGET)
    TN = _pick_mn_tile(N, _TN_TARGET)   # N<=256 => single N tile => X fetched once per M tile
    TK = _pick_k_tile(K)
    nm, nn, nk = _cdiv(M, TM), _cdiv(N, TN), K // TK

    X = X.astype(_COMPUTE_DTYPE)
    Wm = Wm.astype(_COMPUTE_DTYPE)
    scale = scale.reshape(1, N).astype(_ACC_DTYPE)
    bias = bias.reshape(1, N).astype(_ACC_DTYPE)

    operands = [X, Wm, scale, bias]
    in_specs = [
        pl.BlockSpec((TM, TK), lambda i, j, k: (i, k)),
        pl.BlockSpec((TK, TN), lambda i, j, k: (k, j)),
        pl.BlockSpec((1, TN), lambda i, j, k: (0, j)),
        pl.BlockSpec((1, TN), lambda i, j, k: (0, j)),
    ]
    has_res = res2d is not None
    if has_res:
        operands.append(res2d.astype(_COMPUTE_DTYPE))
        in_specs.append(pl.BlockSpec((TM, TN), lambda i, j, k: (i, j)))

    bytes_accessed = 2 * (M * K + K * N + M * N * (2 if has_res else 1)) + 8 * N
    cost = pl.CostEstimate(flops=2 * M * N * K, transcendentals=0,
                           bytes_accessed=int(bytes_accessed))

    return pl.pallas_call(
        functools.partial(_matmul_kernel, relu=relu, has_res=has_res),
        out_shape=jax.ShapeDtypeStruct((M, N), out_dtype),
        grid=(nm, nn, nk),
        in_specs=in_specs,
        out_specs=pl.BlockSpec((TM, TN), lambda i, j, k: (i, j)),
        scratch_shapes=[pltpu.VMEM((TM, TN), _ACC_DTYPE)],
        compiler_params=pltpu.CompilerParams(
            dimension_semantics=("parallel", "parallel", "arbitrary"),
            vmem_limit_bytes=_VMEM_LIMIT),
        cost_estimate=cost,
    )(*operands)


# ----------------------------------------------------------------------------------------
# Kernel 2: direct kxk (stride-1) conv.  A group of padded images lives in VMEM and the
# k*k taps are accumulated on the MXU in-kernel — no im2col buffer ever hits HBM.
# ----------------------------------------------------------------------------------------
def _conv_direct_kernel(x_ref, w_ref, s_ref, b_ref, *rest,
                        relu, has_res, kh, kw, dilation, Ho, Wo):
    if has_res:
        res_ref, o_ref = rest
    else:
        (o_ref,) = rest
    TB = o_ref.shape[0]
    TN = o_ref.shape[3]
    Cin = x_ref.shape[3]
    rows = TB * Ho * Wo

    acc = jnp.zeros((rows, TN), jnp.float32)
    for ky in range(kh):
        for kx in range(kw):
            y0 = ky * dilation
            x0 = kx * dilation
            patch = x_ref[:, y0:y0 + Ho, x0:x0 + Wo, :].reshape(rows, Cin)
            acc = acc + jnp.dot(patch, w_ref[ky, kx, :, :],
                                preferred_element_type=jnp.float32)

    y = acc * s_ref[...] + b_ref[...]
    if has_res:
        y = y + res_ref[...].reshape(rows, TN).astype(jnp.float32)
    if relu:
        y = jnp.maximum(y, 0.0)
    o_ref[...] = y.reshape(TB, Ho, Wo, TN).astype(o_ref.dtype)


def conv_direct(x_nhwc, w_oihw, scale, bias, *, padding, dilation,
                relu=False, residual_nhwc=None, out_dtype=_COMPUTE_DTYPE):
    Cout, Cin, kh, kw = w_oihw.shape
    N, H, W, _ = x_nhwc.shape
    Ho = H + 2 * padding - dilation * (kh - 1)
    Wo = W + 2 * padding - dilation * (kw - 1)
    Hp, Wp = H + 2 * padding, W + 2 * padding

    xp = jnp.pad(x_nhwc.astype(_COMPUTE_DTYPE),
                 ((0, 0), (padding, padding), (padding, padding), (0, 0)))
    Wm = jnp.transpose(w_oihw, (2, 3, 1, 0)).astype(_COMPUTE_DTYPE)   # (kh,kw,Cin,Cout)
    scale = scale.reshape(1, Cout).astype(_ACC_DTYPE)
    bias = bias.reshape(1, Cout).astype(_ACC_DTYPE)

    TN = _pick_mn_tile(Cout, _TN_TARGET)
    rows_per_img = Ho * Wo
    tb = min(N,
             max(1, 1024 // rows_per_img),                       # ~1K output rows / step
             max(1, (4 << 20) // (Hp * Wp * Cin * 2)))           # <=4 MiB input slab
    nb, nn = _cdiv(N, tb), _cdiv(Cout, TN)

    operands = [xp, Wm, scale, bias]
    in_specs = [
        pl.BlockSpec((tb, Hp, Wp, Cin), lambda b, j: (b, 0, 0, 0)),
        pl.BlockSpec((kh, kw, Cin, TN), lambda b, j: (0, 0, 0, j)),
        pl.BlockSpec((1, TN), lambda b, j: (0, j)),
        pl.BlockSpec((1, TN), lambda b, j: (0, j)),
    ]
    has_res = residual_nhwc is not None
    if has_res:
        operands.append(residual_nhwc.astype(_COMPUTE_DTYPE))
        in_specs.append(pl.BlockSpec((tb, Ho, Wo, TN), lambda b, j: (b, 0, 0, j)))

    flops = 2 * N * Ho * Wo * Cout * Cin * kh * kw
    bytes_accessed = 2 * (N * Hp * Wp * Cin + kh * kw * Cin * Cout
                          + N * Ho * Wo * Cout * (2 if has_res else 1))
    cost = pl.CostEstimate(flops=int(flops), transcendentals=0,
                           bytes_accessed=int(bytes_accessed))

    out = pl.pallas_call(
        functools.partial(_conv_direct_kernel, relu=relu, has_res=has_res,
                          kh=kh, kw=kw, dilation=dilation, Ho=Ho, Wo=Wo),
        out_shape=jax.ShapeDtypeStruct((N, Ho, Wo, Cout), out_dtype),
        grid=(nb, nn),
        in_specs=in_specs,
        out_specs=pl.BlockSpec((tb, Ho, Wo, TN), lambda b, j: (b, 0, 0, j)),
        compiler_params=pltpu.CompilerParams(
            dimension_semantics=("parallel", "parallel"),
            vmem_limit_bytes=_VMEM_LIMIT),
        cost_estimate=cost,
    )(*operands)
    return out


# ----------------------------------------------------------------------------------------
# Conv router: 1x1 -> reshape + fused matmul; kxk stride 1 -> direct conv kernel;
#              kxk strided -> explicit im2col into the fused matmul kernel (fallback).
# ----------------------------------------------------------------------------------------
def conv_bn_act(x_nhwc, w_oihw, scale, bias, *, stride=1, padding=0, dilation=1,
                relu=False, residual_nhwc=None):
    Cout, Cin, kh, kw = w_oihw.shape
    N, H, W, _ = x_nhwc.shape

    if kh == 1 and kw == 1:
        xs = x_nhwc[:, ::stride, ::stride, :] if stride > 1 else x_nhwc
        Ho, Wo = xs.shape[1], xs.shape[2]
        X = xs.reshape(N * Ho * Wo, Cin)
        Wm = w_oihw.reshape(Cout, Cin).T
        res2d = (residual_nhwc.reshape(N * Ho * Wo, Cout)
                 if residual_nhwc is not None else None)
        out = fused_matmul_bn(X, Wm, scale, bias, res2d=res2d, relu=relu)
        return out.reshape(N, Ho, Wo, Cout)

    if stride == 1:
        try:
            return conv_direct(x_nhwc, w_oihw, scale, bias, padding=padding,
                               dilation=dilation, relu=relu,
                               residual_nhwc=residual_nhwc)
        except Exception:
            # Safety net: if the direct conv kernel fails to lower on this TPU
            # generation, fall back to the (validated) im2col path below.
            pass

    # TODO(synk): strided k>1 convs (one per unit) still materialize an explicit im2col;
    # a fully fused version needs manual-DMA tap gathering for the strided windows.
    Ho = (H + 2 * padding - dilation * (kh - 1) - 1) // stride + 1
    Wo = (W + 2 * padding - dilation * (kw - 1) - 1) // stride + 1
    xp = jnp.pad(x_nhwc, ((0, 0), (padding, padding), (padding, padding), (0, 0)))
    patches = []
    for ky in range(kh):
        for kx in range(kw):
            y0, x0 = ky * dilation, kx * dilation
            patches.append(
                xp[:, y0:y0 + (Ho - 1) * stride + 1:stride,
                   x0:x0 + (Wo - 1) * stride + 1:stride, :])
    X = jnp.concatenate(patches, axis=-1).reshape(N * Ho * Wo, kh * kw * Cin)
    Wm = jnp.transpose(w_oihw, (2, 3, 1, 0)).reshape(kh * kw * Cin, Cout)
    res2d = (residual_nhwc.reshape(N * Ho * Wo, Cout)
             if residual_nhwc is not None else None)
    out = fused_matmul_bn(X, Wm, scale, bias, res2d=res2d, relu=relu)
    return out.reshape(N, Ho, Wo, Cout)


# ----------------------------------------------------------------------------------------
# Temporal shift (TSM) — pure data movement, kept as JAX glue.
# ----------------------------------------------------------------------------------------
def temporal_shift_nhwc(x, num_frames, frac):
    bt, h, w, c = x.shape
    b = bt // num_frames
    n = int(c * frac)
    if n == 0:
        return x
    x5 = x.reshape(b, num_frames, h, w, c)
    back = jnp.pad(x5[:, 1:, :, :, c - n:], ((0, 0), (0, 1), (0, 0), (0, 0), (0, 0)))
    fwd = jnp.pad(x5[:, :-1, :, :, :n], ((0, 0), (1, 0), (0, 0), (0, 0), (0, 0)))
    mid = x5[..., n:c - n]
    return jnp.concatenate([back, mid, fwd], axis=-1).reshape(bt, h, w, c)


def temporal_shift_nchw(x, num_frames, frac):
    bt, c, h, w = x.shape
    b = bt // num_frames
    n = int(c * frac)
    if n == 0:
        return x
    x5 = x.reshape(b, num_frames, c, h, w)
    back = jnp.pad(x5[:, 1:, c - n:], ((0, 0), (0, 1), (0, 0), (0, 0), (0, 0)))
    fwd = jnp.pad(x5[:, :-1, :n], ((0, 0), (1, 0), (0, 0), (0, 0), (0, 0)))
    mid = x5[:, :, n:c - n]
    return jnp.concatenate([back, mid, fwd], axis=2).reshape(bt, c, h, w)


def bn_fold(bn, eps=1e-5):
    gamma, beta, mean, var = bn
    s = gamma / jnp.sqrt(var + eps)
    return s, beta - mean * s


# ----------------------------------------------------------------------------------------
# TSMResNetBlockV1 / TSMResNetUnit forward (Pallas path; NHWC bf16 inside the unit)
# ----------------------------------------------------------------------------------------
def tsm_block_pallas(x, p, *, stride, dilation, use_projection, num_frames,
                     shift_frac, use_bottleneck, style='pytorch'):
    conv1_stride = 1 if style == 'pytorch' else stride
    conv2_stride = stride if style == 'pytorch' else 1

    if use_projection:
        ds_s, ds_b = bn_fold(p['ds_bn'])
        shortcut = conv_bn_act(x, p['ds_w'], ds_s, ds_b,
                               stride=stride, padding=0, relu=False)
    else:
        shortcut = x

    pre = temporal_shift_nhwc(x, num_frames, shift_frac) if shift_frac != 0 else x

    s1, b1 = bn_fold(p['bn1'])
    s3, b3 = bn_fold(p['bn3'])
    if use_bottleneck:
        r = conv_bn_act(pre, p['w1'], s1, b1, stride=conv1_stride, padding=0, relu=True)
        s2, b2 = bn_fold(p['bn2'])
        r = conv_bn_act(r, p['w2'], s2, b2, stride=conv2_stride, padding=1,
                        dilation=dilation, relu=True)
        out = conv_bn_act(r, p['w3'], s3, b3, stride=1, padding=0,
                          relu=True, residual_nhwc=shortcut)
    else:
        r = conv_bn_act(pre, p['w1'], s1, b1, stride=stride, padding=1, relu=True)
        out = conv_bn_act(r, p['w3'], s3, b3, stride=1, padding=1,
                          relu=True, residual_nhwc=shortcut)
    return out


def tsm_resnet_unit_pallas(x_nchw, block_params, *, stride, num_frames, shift_frac,
                           dilation, use_bottleneck, style='pytorch'):
    x = jnp.transpose(x_nchw, (0, 2, 3, 1)).astype(_COMPUTE_DTYPE)   # NHWC bf16, once
    for i, p in enumerate(block_params):
        x = tsm_block_pallas(
            x, p,
            stride=stride if i == 0 else 1,
            dilation=max(dilation // 2, 1) if i == 0 else dilation,
            use_projection=(i == 0),
            num_frames=num_frames, shift_frac=shift_frac,
            use_bottleneck=use_bottleneck, style=style)
    return jnp.transpose(x, (0, 3, 1, 2)).astype(jnp.float32)


# ----------------------------------------------------------------------------------------
# Pure-JAX f32 reference (lax.conv), same semantics, for the correctness check
# ----------------------------------------------------------------------------------------
def _conv_ref(x, w, stride, padding, dilation=1):
    return jax.lax.conv_general_dilated(
        x, w, window_strides=(stride, stride),
        padding=((padding, padding), (padding, padding)),
        rhs_dilation=(dilation, dilation),
        dimension_numbers=('NCHW', 'OIHW', 'NCHW'))


def _bn_ref(x, bn, eps=1e-5):
    gamma, beta, mean, var = bn
    s = gamma / jnp.sqrt(var + eps)
    b = beta - mean * s
    return x * s[None, :, None, None] + b[None, :, None, None]


def tsm_block_ref(x, p, *, stride, dilation, use_projection, num_frames,
                  shift_frac, use_bottleneck, style='pytorch'):
    conv1_stride = 1 if style == 'pytorch' else stride
    conv2_stride = stride if style == 'pytorch' else 1
    shortcut = _bn_ref(_conv_ref(x, p['ds_w'], stride, 0), p['ds_bn']) if use_projection else x
    pre = temporal_shift_nchw(x, num_frames, shift_frac) if shift_frac != 0 else x
    if use_bottleneck:
        r = jax.nn.relu(_bn_ref(_conv_ref(pre, p['w1'], conv1_stride, 0), p['bn1']))
        r = jax.nn.relu(_bn_ref(_conv_ref(r, p['w2'], conv2_stride, 1, dilation), p['bn2']))
        r = _bn_ref(_conv_ref(r, p['w3'], 1, 0), p['bn3'])
    else:
        r = jax.nn.relu(_bn_ref(_conv_ref(pre, p['w1'], stride, 1), p['bn1']))
        r = _bn_ref(_conv_ref(r, p['w3'], 1, 1), p['bn3'])
    return jax.nn.relu(shortcut + r)


def tsm_resnet_unit_ref(x, block_params, *, stride, num_frames, shift_frac,
                        dilation, use_bottleneck, style='pytorch'):
    for i, p in enumerate(block_params):
        x = tsm_block_ref(
            x, p,
            stride=stride if i == 0 else 1,
            dilation=max(dilation // 2, 1) if i == 0 else dilation,
            use_projection=(i == 0),
            num_frames=num_frames, shift_frac=shift_frac,
            use_bottleneck=use_bottleneck, style=style)
    return x


# ----------------------------------------------------------------------------------------
# Deterministic parameter construction (shapes follow TSMResNetBlockV1.__init__)
# ----------------------------------------------------------------------------------------
def init_block_params(key, in_c, out_channels, use_projection, use_bottleneck):
    out_c = out_channels if use_bottleneck else out_channels // 4
    mid_c = out_channels // 4
    ks = jax.random.split(key, 8)

    def conv_w(k, cout, cin, ksz):
        fan_in = cin * ksz * ksz
        return jax.random.normal(k, (cout, cin, ksz, ksz), jnp.float32) / np.sqrt(fan_in)

    def bn(k, c):
        k1, k2, k3, k4 = jax.random.split(k, 4)
        gamma = 1.0 + 0.1 * jax.random.normal(k1, (c,), jnp.float32)
        beta = 0.1 * jax.random.normal(k2, (c,), jnp.float32)
        mean = 0.1 * jax.random.normal(k3, (c,), jnp.float32)
        var = 1.0 + 0.2 * jax.random.uniform(k4, (c,), jnp.float32)
        return gamma, beta, mean, var

    p = {}
    if use_projection:
        p['ds_w'] = conv_w(ks[0], out_c, in_c, 1)
        p['ds_bn'] = bn(ks[1], out_c)
    k1 = 1 if use_bottleneck else 3
    p['w1'] = conv_w(ks[2], mid_c, in_c, k1)
    p['bn1'] = bn(ks[3], mid_c)
    p['w2'] = conv_w(ks[4], mid_c, mid_c, 3)   # only used when use_bottleneck
    p['bn2'] = bn(ks[5], mid_c)
    p['w3'] = conv_w(ks[6], out_c, mid_c, 1 if use_bottleneck else 3)
    p['bn3'] = bn(ks[7], out_c)
    return p


# ----------------------------------------------------------------------------------------
if __name__ == "__main__":
    B, T = 2, 4                       # batch, num_frames  -> leading dim B*T = 8
    in_channels, out_channels = 16, 32
    H = W = 16
    num_blocks, stride, dilation = 2, 2, 1
    shift_frac, use_bottleneck = 0.125, True

    key = jax.random.PRNGKey(0)
    kx, kp = jax.random.split(key)
    x = jax.random.normal(kx, (B * T, in_channels, H, W), jnp.float32)   # NCHW

    block_params = []
    in_c = in_channels
    out_c_block = out_channels if use_bottleneck else out_channels // 4
    for i in range(num_blocks):
        kp, kb = jax.random.split(kp)
        block_params.append(
            init_block_params(kb, in_c, out_channels, use_projection=(i == 0),
                              use_bottleneck=use_bottleneck))
        in_c = out_c_block

    out_pallas = tsm_resnet_unit_pallas(
        x, block_params, stride=stride, num_frames=T, shift_frac=shift_frac,
        dilation=dilation, use_bottleneck=use_bottleneck)
    out_pallas = jax.block_until_ready(out_pallas)

    out_ref = tsm_resnet_unit_ref(
        x, block_params, stride=stride, num_frames=T, shift_frac=shift_frac,
        dilation=dilation, use_bottleneck=use_bottleneck)
    out_ref = jax.block_until_ready(out_ref)

    assert out_pallas.shape == (B * T, out_c_block, H // stride, W // stride)
    # bf16 activation pipeline vs f32 reference -> loose tolerance
    np.testing.assert_allclose(np.asarray(out_pallas), np.asarray(out_ref),
                               rtol=5e-2, atol=5e-2)
    print("KERNEL_OK")
</pallas_src>

<mosaic_0001>
module attributes {stable_mosaic.version = 11 : i64} {
  func.func @_matmul_kernel(%arg0: i32, %arg1: i32, %arg2: i32, %arg3: memref<512x16xbf16, #tpu.memory_space<vmem>>, %arg4: memref<16x32xbf16, #tpu.memory_space<vmem>>, %arg5: memref<1x32xf32, #tpu.memory_space<vmem>>, %arg6: memref<1x32xf32, #tpu.memory_space<vmem>>, %arg7: memref<512x32xbf16, #tpu.memory_space<vmem>>, %arg8: memref<512x32xf32, #tpu.memory_space<vmem>>) attributes {dimension_semantics = [#tpu.dimension_semantics<parallel>, #tpu.dimension_semantics<parallel>, #tpu.dimension_semantics<arbitrary>], iteration_bounds = array<i64: 1, 1, 1>, scalar_prefetch = 0 : i64, scratch_operands = 1 : i64, tpu.core_type = #tpu.core_type<tc>, window_params = [{transform_indices = @transform_0, window_bounds = array<i64: 512, 16>}, {transform_indices = @transform_1, window_bounds = array<i64: 16, 32>}, {transform_indices = @transform_2, window_bounds = array<i64: 1, 32>}, {transform_indices = @transform_3, window_bounds = array<i64: 1, 32>}, {transform_indices = @transform_4, window_bounds = array<i64: 512, 32>}]} {
    %c0_i32 = arith.constant 0 : i32
    %0 = arith.cmpi eq, %arg2, %c0_i32 : i32
    %1 = arith.extui %0 : i1 to i32
    %c0_i32_0 = arith.constant 0 : i32
    %2 = arith.cmpi ne, %1, %c0_i32_0 : i32
    scf.if %2 {
      %cst_10 = arith.constant 0.000000e+00 : f32
      %12 = vector.broadcast %cst_10 : f32 to vector<512x32xf32>
      %c0_11 = arith.constant 0 : index
      %c0_12 = arith.constant 0 : index
      %13 = vector.load %arg8[%c0_11, %c0_12] : memref<512x32xf32, #tpu.memory_space<vmem>>, vector<512x32xf32>
      tpu.vector_store %arg8[%c0_11, %c0_12], %12 {strides = array<i32>} : memref<512x32xf32, #tpu.memory_space<vmem>>, vector<512x32xf32>,
    } else {
    }
    %c0 = arith.constant 0 : index
    %c0_1 = arith.constant 0 : index
    %3 = vector.load %arg8[%c0, %c0_1] : memref<512x32xf32, #tpu.memory_space<vmem>>, vector<512x32xf32>
    %c0_2 = arith.constant 0 : index
    %c0_3 = arith.constant 0 : index
    %4 = vector.load %arg3[%c0_2, %c0_3] : memref<512x16xbf16, #tpu.memory_space<vmem>>, vector<512x16xbf16>
    %c0_4 = arith.constant 0 : index
    %c0_5 = arith.constant 0 : index
    %5 = vector.load %arg4[%c0_4, %c0_5] : memref<16x32xbf16, #tpu.memory_space<vmem>>, vector<16x32xbf16>
    %cst = arith.constant dense<0.000000e+00> : vector<512x32xf32>
    %6 = tpu.matmul %4, %5, %cst {dimension_numbers = #tpu.dot_dimension_numbers<[1], [0], [0], [1], [0, 0, 1, 1], [], []>} : vector<512x16xbf16>, vector<16x32xbf16>, vector<512x32xf32> -> vector<512x32xf32>
    %7 = arith.addf %3, %6 : vector<512x32xf32>
    %c0_6 = arith.constant 0 : index
    %c0_7 = arith.constant 0 : index
    %8 = vector.load %arg8[%c0_6, %c0_7] : memref<512x32xf32, #tpu.memory_space<vmem>>, vector<512x32xf32>
    tpu.vector_store %arg8[%c0_6, %c0_7], %7 {strides = array<i32>} : memref<512x32xf32, #tpu.memory_space<vmem>>, vector<512x32xf32>,
    %c0_i32_8 = arith.constant 0 : i32
    %9 = arith.cmpi eq, %arg2, %c0_i32_8 : i32
    %10 = arith.extui %9 : i1 to i32
    %c0_i32_9 = arith.constant 0 : i32
    %11 = arith.cmpi ne, %10, %c0_i32_9 : i32
    scf.if %11 {
      %c0_10 = arith.constant 0 : index
      %c0_11 = arith.constant 0 : index
      %12 = vector.load %arg8[%c0_10, %c0_11] : memref<512x32xf32, #tpu.memory_space<vmem>>, vector<512x32xf32>
      %c0_12 = arith.constant 0 : index
      %c0_13 = arith.constant 0 : index
      %13 = vector.load %arg5[%c0_12, %c0_13] : memref<1x32xf32, #tpu.memory_space<vmem>>, vector<1x32xf32>
      %14 = vector.broadcast %13 : vector<1x32xf32> to vector<512x32xf32>
      %15 = arith.mulf %12, %14 : vector<512x32xf32>
      %c0_14 = arith.constant 0 : index
      %c0_15 = arith.constant 0 : index
      %16 = vector.load %arg6[%c0_14, %c0_15] : memref<1x32xf32, #tpu.memory_space<vmem>>, vector<1x32xf32>
      %17 = vector.broadcast %16 : vector<1x32xf32> to vector<512x32xf32>
      %18 = arith.addf %15, %17 : vector<512x32xf32>
      %19 = arith.truncf %18 : vector<512x32xf32> to vector<512x32xbf16>
      %c0_16 = arith.constant 0 : index
      %c0_17 = arith.constant 0 : index
      %20 = vector.load %arg7[%c0_16, %c0_17] : memref<512x32xbf16, #tpu.memory_space<vmem>>, vector<512x32xbf16>
      tpu.vector_store %arg7[%c0_16, %c0_17], %19 {strides = array<i32>} : memref<512x32xbf16, #tpu.memory_space<vmem>>, vector<512x32xbf16>,
    } else {
    }
    return
  }
  func.func @transform_0(%arg0: i32, %arg1: i32, %arg2: i32) -> (i32, i32) {
    %c0_i32 = arith.constant 0 : i32
    return %arg0, %arg2 : i32, i32
  }
  func.func @transform_1(%arg0: i32, %arg1: i32, %arg2: i32) -> (i32, i32) {
    %c0_i32 = arith.constant 0 : i32
    return %arg2, %arg1 : i32, i32
  }
  func.func @transform_2(%arg0: i32, %arg1: i32, %arg2: i32) -> (i32, i32) {
    %c0_i32 = arith.constant 0 : i32
    %c0_i32_0 = arith.constant 0 : i32
    return %c0_i32, %arg1 : i32, i32
  }
  func.func @transform_3(%arg0: i32, %arg1: i32, %arg2: i32) -> (i32, i32) {
    %c0_i32 = arith.constant 0 : i32
    %c0_i32_0 = arith.constant 0 : i32
    return %c0_i32, %arg1 : i32, i32
  }
  func.func @transform_4(%arg0: i32, %arg1: i32, %arg2: i32) -> (i32, i32) {
    %c0_i32 = arith.constant 0 : i32
    return %arg0, %arg1 : i32, i32
  }
}

</mosaic_0001>

<bundles_post_ra>
// kernel: tpu_custom_call.1
= control target key start
LH: loop header
LB: loop body
LE: loop exit
PB: predicated region body
PF: predicated region fallthrough
CT: control target
= control target key end

     0   :  { %vm22_vm0 = vcmask 261120   ;;  %v1764_v1 = vmov 0.0   ;;  %vm383_vm1 = vcmask 130048   ;;  %vm1363_vm2 = vcmask 257024   ;;  %s2507_s1 = inlined_call_operand.vmem [shape: bf16[16,32], index: 1, kind: input, shape index: {}]   ;;  %s2508_s0 = inlined_call_operand.vmem [shape: bf16[512,16], index: 0, kind: input, shape index: {}]   ;;  %s2509_s2 = inlined_call_operand.vmem [shape: f32[1,32], index: 2, kind: input, shape index: {}]   ;;  %s2510_s3 = inlined_call_operand.vmem [shape: f32[1,32], index: 3, kind: input, shape index: {}]   ;;  %s2511_s4 = inlined_call_operand.vmem [shape: bf16[512,32], index: 4, kind: output, shape index: {}]  }
   0x1   :  { %v1793_v0 = vld [vmem:[%s2507_s1] sm:$0xff]   ;;  %25 = vst.msk [vmem:[#allocation2 + $0x10] sm:$0xff] %vm22_vm0, %v1764_v1  ;;  %23 = vst.msk [vmem:[#allocation2] sm:$0xff] %vm22_vm0, %v1764_v1  ;;  %v1732_v4 = vld [vmem:[%s2508_s0 + $0x8] sm:$0xff]  }
   0x2   :  { %24 = vst.msk [vmem:[#allocation2 + $0x8] sm:$0xff] %vm22_vm0, %v1764_v1  ;;  %26 = vst.msk [vmem:[#allocation2 + $0x18] sm:$0xff] %vm22_vm0, %v1764_v1  ;;  %v1730_v2 = vld [vmem:[%s2508_s0] sm:$0xff]   ;;  %1660 = vmatprep.subr.bf16.mxu0 %v1793_v0  ;;  %1726 = vmatprep.subr.bf16.mxu1 %v1793_v0  ;;  %v1733_v5 = vld [vmem:[%s2508_s0 + $0x88] sm:$0xff]  }
   0x3   :  { %27 = vst.msk [vmem:[#allocation2 + $0x20] sm:$0xff] %vm22_vm0, %v1764_v1  ;;  %28 = vst.msk [vmem:[#allocation2 + $0x28] sm:$0xff] %vm22_vm0, %v1764_v1  ;;  %v1731_v3 = vld [vmem:[%s2508_s0 + $0x80] sm:$0xff]   ;;  %1661 = vmatpush3.bf16.msra.mxu0 %v1793_v0  ;;  %1727 = vmatpush3.bf16.msra.mxu1 %v1793_v0  ;;  %v1734_v6 = vld [vmem:[%s2508_s0 + $0x10] sm:$0xff]  }
   0x4   :  { %29 = vst.msk [vmem:[#allocation2 + $0x30] sm:$0xff] %vm22_vm0, %v1764_v1  ;;  %30 = vst.msk [vmem:[#allocation2 + $0x38] sm:$0xff] %vm22_vm0, %v1764_v1  ;;  %1662 = vmatprep.mubr.msk.bf16.mxu0 %vm383_vm1, %v1730_v2  ;;  %1694 = vmatprep.mubr.msk.bf16.mxu1 %vm383_vm1, %v1731_v3  ;;  %v1735_v7 = vld [vmem:[%s2508_s0 + $0x90] sm:$0xff]   ;;  %v1736_v8 = vld [vmem:[%s2508_s0 + $0x18] sm:$0xff]  }
   0x5   :  { %31 = vst.msk [vmem:[#allocation2 + $0x40] sm:$0xff] %vm22_vm0, %v1764_v1  ;;  %32 = vst.msk [vmem:[#allocation2 + $0x48] sm:$0xff] %vm22_vm0, %v1764_v1  ;;  %v1737_v9 = vld [vmem:[%s2508_s0 + $0x98] sm:$0xff]   ;;  %v1738_v10 = vld [vmem:[%s2508_s0 + $0x20] sm:$0xff]  }
   0x6   :  { %33 = vst.msk [vmem:[#allocation2 + $0x50] sm:$0xff] %vm22_vm0, %v1764_v1  ;;  %34 = vst.msk [vmem:[#allocation2 + $0x58] sm:$0xff] %vm22_vm0, %v1764_v1  ;;  %1663 = vmatmul.mubr.msk.bf16.vlgmr.msra.gmra.mxu0 %vm383_vm1, %v1732_v4  ;;  %1695 = vmatmul.mubr.msk.bf16.vlgmr.msra.gmra.mxu1 %vm383_vm1, %v1733_v5  ;;  %v1739_v11 = vld [vmem:[%s2508_s0 + $0xa0] sm:$0xff]   ;;  %v1740_v12 = vld [vmem:[%s2508_s0 + $0x28] sm:$0xff]  }
   0x7   :  { %35 = vst.msk [vmem:[#allocation2 + $0x60] sm:$0xff] %vm22_vm0, %v1764_v1  ;;  %36 = vst.msk [vmem:[#allocation2 + $0x68] sm:$0xff] %vm22_vm0, %v1764_v1  ;;  %1666 = vmatprep.mubr.msk.bf16.mxu0 %vm383_vm1, %v1734_v6  ;;  %1698 = vmatprep.mubr.msk.bf16.mxu1 %vm383_vm1, %v1735_v7  ;;  %v1741_v13 = vld [vmem:[%s2508_s0 + $0xa8] sm:$0xff]   ;;  %v1742_v14 = vld [vmem:[%s2508_s0 + $0x30] sm:$0xff]  }
   0x8   :  { %37 = vst.msk [vmem:[#allocation2 + $0x70] sm:$0xff] %vm22_vm0, %v1764_v1  ;;  %38 = vst.msk [vmem:[#allocation2 + $0x78] sm:$0xff] %vm22_vm0, %v1764_v1  ;;  %v1743_v15 = vld [vmem:[%s2508_s0 + $0xb0] sm:$0xff]   ;;  %v1744_v16 = vld [vmem:[%s2508_s0 + $0x38] sm:$0xff]  }
   0x9   :  { %39 = vst.msk [vmem:[#allocation2 + $0x80] sm:$0xff] %vm22_vm0, %v1764_v1  ;;  %40 = vst.msk [vmem:[#allocation2 + $0x88] sm:$0xff] %vm22_vm0, %v1764_v1  ;;  %v1745_v17 = vld [vmem:[%s2508_s0 + $0xb8] sm:$0xff]   ;;  %v1746_v18 = vld [vmem:[%s2508_s0 + $0x40] sm:$0xff]  }
   0xa   :  { %41 = vst.msk [vmem:[#allocation2 + $0x90] sm:$0xff] %vm22_vm0, %v1764_v1  ;;  %42 = vst.msk [vmem:[#allocation2 + $0x98] sm:$0xff] %vm22_vm0, %v1764_v1  ;;  %v1747_v19 = vld [vmem:[%s2508_s0 + $0xc0] sm:$0xff]   ;;  %v1748_v20 = vld [vmem:[%s2508_s0 + $0x48] sm:$0xff]  }
   0xb   :  { %43 = vst.msk [vmem:[#allocation2 + $0xa0] sm:$0xff] %vm22_vm0, %v1764_v1  ;;  %44 = vst.msk [vmem:[#allocation2 + $0xa8] sm:$0xff] %vm22_vm0, %v1764_v1  ;;  %v1749_v21 = vld [vmem:[%s2508_s0 + $0xc8] sm:$0xff]   ;;  %v1750_v22 = vld [vmem:[%s2508_s0 + $0x50] sm:$0xff]  }
   0xc   :  { %45 = vst.msk [vmem:[#allocation2 + $0xb0] sm:$0xff] %vm22_vm0, %v1764_v1  ;;  %46 = vst.msk [vmem:[#allocation2 + $0xb8] sm:$0xff] %vm22_vm0, %v1764_v1  ;;  %v1751_v23 = vld [vmem:[%s2508_s0 + $0xd0] sm:$0xff]   ;;  %v1752_v24 = vld [vmem:[%s2508_s0 + $0x58] sm:$0xff]  }
   0xd   :  { %47 = vst.msk [vmem:[#allocation2 + $0xc0] sm:$0xff] %vm22_vm0, %v1764_v1  ;;  %48 = vst.msk [vmem:[#allocation2 + $0xc8] sm:$0xff] %vm22_vm0, %v1764_v1  ;;  %v1753_v25 = vld [vmem:[%s2508_s0 + $0xd8] sm:$0xff]   ;;  %v1754_v26 = vld [vmem:[%s2508_s0 + $0x60] sm:$0xff]  }
   0xe   :  { %49 = vst.msk [vmem:[#allocation2 + $0xd0] sm:$0xff] %vm22_vm0, %v1764_v1  ;;  %50 = vst.msk [vmem:[#allocation2 + $0xd8] sm:$0xff] %vm22_vm0, %v1764_v1  ;;  %1667 = vmatmul.mubr.msk.bf16.gmra.mxu0 %vm383_vm1, %v1736_v8  ;;  %1699 = vmatmul.mubr.msk.bf16.gmra.mxu1 %vm383_vm1, %v1737_v9  ;;  %v1755_v27 = vld [vmem:[%s2508_s0 + $0xe0] sm:$0xff]   ;;  %v1756_v28 = vld [vmem:[%s2508_s0 + $0x68] sm:$0xff]  }
   0xf   :  { %51 = vst.msk [vmem:[#allocation2 + $0xe0] sm:$0xff] %vm22_vm0, %v1764_v1  ;;  %52 = vst.msk [vmem:[#allocation2 + $0xe8] sm:$0xff] %vm22_vm0, %v1764_v1  ;;  %1670 = vmatprep.mubr.msk.bf16.mxu0 %vm383_vm1, %v1738_v10  ;;  %1702 = vmatprep.mubr.msk.bf16.mxu1 %vm383_vm1, %v1739_v11  ;;  %v1757_v29 = vld [vmem:[%s2508_s0 + $0xe8] sm:$0xff]   ;;  %v1758_v30 = vld [vmem:[%s2508_s0 + $0x70] sm:$0xff]  }
  0x10   :  { %53 = vst.msk [vmem:[#allocation2 + $0xf0] sm:$0xff] %vm22_vm0, %v1764_v1  ;;  %54 = vst.msk [vmem:[#allocation2 + $0xf8] sm:$0xff] %vm22_vm0, %v1764_v1  ;;  %v1759_v31 = vld [vmem:[%s2508_s0 + $0xf0] sm:$0xff]   ;;  %v1760_v32 = vld [vmem:[%s2508_s0 + $0x78] sm:$0xff]  }
  0x11   :  { %55 = vst.msk [vmem:[#allocation2 + $0x100] sm:$0xff] %vm22_vm0, %v1764_v1  ;;  %56 = vst.msk [vmem:[#allocation2 + $0x108] sm:$0xff] %vm22_vm0, %v1764_v1  ;;  %v1761_v33 = vld [vmem:[%s2508_s0 + $0xf8] sm:$0xff]   ;;  %v89_v34 = vld [vmem:[#allocation2 + $0x10] sm:$0xff] }
  0x12   :  { %57 = vst.msk [vmem:[#allocation2 + $0x110] sm:$0xff] %vm22_vm0, %v1764_v1  ;;  %58 = vst.msk [vmem:[#allocation2 + $0x118] sm:$0xff] %vm22_vm0, %v1764_v1  ;;  %v87_v38 = vld [vmem:[#allocation2] sm:$0xff]  ;;  %v90_v44 = vld [vmem:[#allocation2 + $0x18] sm:$0xff] }
  0x13   :  { %59 = vst.msk [vmem:[#allocation2 + $0x120] sm:$0xff] %vm22_vm0, %v1764_v1  ;;  %60 = vst.msk [vmem:[#allocation2 + $0x128] sm:$0xff] %vm22_vm0, %v1764_v1  ;;  %v88_v50 = vld [vmem:[#allocation2 + $0x8] sm:$0xff]  ;;  %v93_v56 = vld [vmem:[#allocation2 + $0x30] sm:$0xff] }
  0x14   :  { %61 = vst.msk [vmem:[#allocation2 + $0x130] sm:$0xff] %vm22_vm0, %v1764_v1  ;;  %62 = vst.msk [vmem:[#allocation2 + $0x138] sm:$0xff] %vm22_vm0, %v1764_v1  ;;  %v2064_v60 = vld [vmem:[%s2509_s2] ss:$0 sm:$0xff] }
  0x15   :  { %63 = vst.msk [vmem:[#allocation2 + $0x140] sm:$0xff] %vm22_vm0, %v1764_v1  ;;  %64 = vst.msk [vmem:[#allocation2 + $0x148] sm:$0xff] %vm22_vm0, %v1764_v1  ;;  %v91_v63 = vld [vmem:[#allocation2 + $0x20] sm:$0xff] }
  0x16   :  { %65 = vst.msk [vmem:[#allocation2 + $0x150] sm:$0xff] %vm22_vm0, %v1764_v1  ;;  %66 = vst.msk [vmem:[#allocation2 + $0x158] sm:$0xff] %vm22_vm0, %v1764_v1  ;;  %1671 = vmatmul.mubr.msk.bf16.gmra.mxu0 %vm383_vm1, %v1740_v12  ;;  %1703 = vmatmul.mubr.msk.bf16.gmra.mxu1 %vm383_vm1, %v1741_v13  ;;  %v2071_v4 = vld [vmem:[%s2510_s3] ss:$0 sm:$0xff]  ;;  %v94_v12 = vld [vmem:[#allocation2 + $0x38] sm:$0xff] }
  0x17   :  { %67 = vst.msk [vmem:[#allocation2 + $0x160] sm:$0xff] %vm22_vm0, %v1764_v1  ;;  %68 = vst.msk [vmem:[#allocation2 + $0x168] sm:$0xff] %vm22_vm0, %v1764_v1  ;;  %1674 = vmatprep.mubr.msk.bf16.mxu0 %vm383_vm1, %v1742_v14  ;;  %1706 = vmatprep.mubr.msk.bf16.mxu1 %vm383_vm1, %v1743_v15 }
  0x18   :  { %69 = vst.msk [vmem:[#allocation2 + $0x170] sm:$0xff] %vm22_vm0, %v1764_v1  ;;  %70 = vst.msk [vmem:[#allocation2 + $0x178] sm:$0xff] %vm22_vm0, %v1764_v1  ;;  %v119_v39 = vld [vmem:[#allocation2 + $0x100] sm:$0xff]  ;;  %v120_v51 = vld [vmem:[#allocation2 + $0x108] sm:$0xff] }
  0x19   :  { %71 = vst.msk [vmem:[#allocation2 + $0x180] sm:$0xff] %vm22_vm0, %v1764_v1  ;;  %72 = vst.msk [vmem:[#allocation2 + $0x188] sm:$0xff] %vm22_vm0, %v1764_v1  ;;  %v121_v35 = vld [vmem:[#allocation2 + $0x110] sm:$0xff]  ;;  %v122_v45 = vld [vmem:[#allocation2 + $0x118] sm:$0xff] }
  0x1a   :  { %73 = vst.msk [vmem:[#allocation2 + $0x190] sm:$0xff] %vm22_vm0, %v1764_v1  ;;  %74 = vst.msk [vmem:[#allocation2 + $0x198] sm:$0xff] %vm22_vm0, %v1764_v1  ;;  %v123_v0 = vld [vmem:[#allocation2 + $0x120] sm:$0xff] }
  0x1b   :  { %75 = vst.msk [vmem:[#allocation2 + $0x1a0] sm:$0xff] %vm22_vm0, %v1764_v1  ;;  %76 = vst.msk [vmem:[#allocation2 + $0x1a8] sm:$0xff] %vm22_vm0, %v1764_v1  ;;  %v125_v57 = vld [vmem:[#allocation2 + $0x130] sm:$0xff]  ;;  %v126_v13 = vld [vmem:[#allocation2 + $0x138] sm:$0xff] }
  0x1c   :  { %77 = vst.msk [vmem:[#allocation2 + $0x1b0] sm:$0xff] %vm22_vm0, %v1764_v1  ;;  %78 = vst.msk [vmem:[#allocation2 + $0x1b8] sm:$0xff] %vm22_vm0, %v1764_v1 }
  0x1d   :  { %79 = vst.msk [vmem:[#allocation2 + $0x1c0] sm:$0xff] %vm22_vm0, %v1764_v1  ;;  %80 = vst.msk [vmem:[#allocation2 + $0x1c8] sm:$0xff] %vm22_vm0, %v1764_v1 }
  0x1e   :  { %81 = vst.msk [vmem:[#allocation2 + $0x1d0] sm:$0xff] %vm22_vm0, %v1764_v1  ;;  %82 = vst.msk [vmem:[#allocation2 + $0x1d8] sm:$0xff] %vm22_vm0, %v1764_v1  ;;  %1675 = vmatmul.mubr.msk.bf16.gmra.mxu0 %vm383_vm1, %v1744_v16  ;;  %1707 = vmatmul.mubr.msk.bf16.gmra.mxu1 %vm383_vm1, %v1745_v17 }
  0x1f   :  { %83 = vst.msk [vmem:[#allocation2 + $0x1e0] sm:$0xff] %vm22_vm0, %v1764_v1  ;;  %84 = vst.msk [vmem:[#allocation2 + $0x1e8] sm:$0xff] %vm22_vm0, %v1764_v1  ;;  %1678 = vmatprep.mubr.msk.bf16.mxu0 %vm383_vm1, %v1746_v18  ;;  %1710 = vmatprep.mubr.msk.bf16.mxu1 %vm383_vm1, %v1747_v19 }
  0x20   :  { %85 = vst.msk [vmem:[#allocation2 + $0x1f0] sm:$0xff] %vm22_vm0, %v1764_v1  ;;  %86 = vst.msk [vmem:[#allocation2 + $0x1f8] sm:$0xff] %vm22_vm0, %v1764_v1 }
  0x26   :  { %1679 = vmatmul.mubr.msk.bf16.gmra.mxu0 %vm383_vm1, %v1748_v20  ;;  %1711 = vmatmul.mubr.msk.bf16.gmra.mxu1 %vm383_vm1, %v1749_v21 }
  0x27   :  { %1682 = vmatprep.mubr.msk.bf16.mxu0 %vm383_vm1, %v1750_v22  ;;  %1714 = vmatprep.mubr.msk.bf16.mxu1 %vm383_vm1, %v1751_v23  ;;  %v92_v22 = vld [vmem:[#allocation2 + $0x28] sm:$0xff] }
  0x28   :  { %v124_v23 = vld [vmem:[#allocation2 + $0x128] sm:$0xff] }
  0x2e   :  { %1683 = vmatmul.mubr.msk.bf16.gmra.mxu0 %vm383_vm1, %v1752_v24  ;;  %1715 = vmatmul.mubr.msk.bf16.gmra.mxu1 %vm383_vm1, %v1753_v25 }
  0x2f   :  { %1686 = vmatprep.mubr.msk.bf16.mxu0 %vm383_vm1, %v1754_v26  ;;  %1718 = vmatprep.mubr.msk.bf16.mxu1 %vm383_vm1, %v1755_v27 }
  0x36   :  { %1687 = vmatmul.mubr.msk.bf16.gmra.mxu0 %vm383_vm1, %v1756_v28  ;;  %1719 = vmatmul.mubr.msk.bf16.gmra.mxu1 %vm383_vm1, %v1757_v29 }
  0x37   :  { %1690 = vmatprep.mubr.msk.bf16.mxu0 %vm383_vm1, %v1758_v30  ;;  %1722 = vmatprep.mubr.msk.bf16.mxu1 %vm383_vm1, %v1759_v31 }
  0x3e   :  { %1691 = vmatmul.mubr.msk.bf16.gmra.mxu0 %vm383_vm1, %v1760_v32  ;;  %1723 = vmatmul.mubr.msk.bf16.gmra.mxu1 %vm383_vm1, %v1761_v33 }
  0xc6   :  { %v1664_v36 = vpop.f32.mrf.mxu0  ;;  %v1696_v37 = vpop.f32.mrf.mxu1 }
  0xc7   :  { %v771_v40 = vadd.f32 %v1664_v36, %v89_v34  ;;  %v803_v41 = vadd.f32 %v1696_v37, %v121_v35  ;;  %v97_v34 = vld [vmem:[#allocation2 + $0x50] sm:$0xff] }
  0xc8   :  { %v514_v42 = vpop.f32.mrf.mxu0  ;;  %v642_v43 = vpop.f32.mrf.mxu1  ;;  %v129_v35 = vld [vmem:[#allocation2 + $0x150] sm:$0xff] }
  0xc9   :  { %836 = vst.msk [vmem:[#allocation2 + $0x10] sm:$0xff] %vm22_vm0, %v771_v40  ;;  %868 = vst.msk [vmem:[#allocation2 + $0x110] sm:$0xff] %vm22_vm0, %v803_v41  ;;  %v769_v46 = vadd.f32 %v514_v42, %v87_v38  ;;  %v801_v47 = vadd.f32 %v642_v43, %v119_v39 }
  0xca   :  { %v1665_v48 = vpop.f32.mrf.mxu0  ;;  %v1697_v49 = vpop.f32.mrf.mxu1 }
  0xcb   :  { %834 = vst.msk [vmem:[#allocation2] sm:$0xff] %vm22_vm0, %v769_v46  ;;  %866 = vst.msk [vmem:[#allocation2 + $0x100] sm:$0xff] %vm22_vm0, %v801_v47  ;;  %v772_v52 = vadd.f32 %v1665_v48, %v90_v44  ;;  %v804_v53 = vadd.f32 %v1697_v49, %v122_v45  ;;  %v95_v48 = vld [vmem:[#allocation2 + $0x40] sm:$0xff] }
  0xcc   :  { %v517_v54 = vpop.f32.mrf.mxu0  ;;  %v645_v55 = vpop.f32.mrf.mxu1  ;;  %v127_v49 = vld [vmem:[#allocation2 + $0x140] sm:$0xff] }
  0xcd   :  { %837 = vst.msk [vmem:[#allocation2 + $0x18] sm:$0xff] %vm22_vm0, %v772_v52  ;;  %869 = vst.msk [vmem:[#allocation2 + $0x118] sm:$0xff] %vm22_vm0, %v804_v53  ;;  %v770_v58 = vadd.f32 %v517_v54, %v88_v50  ;;  %v802_v59 = vadd.f32 %v645_v55, %v120_v51 }
  0xce   :  { %v1668_v61 = vpop.f32.mrf.mxu0  ;;  %v1700_v62 = vpop.f32.mrf.mxu1 }
  0xcf   :  { %835 = vst.msk [vmem:[#allocation2 + $0x8] sm:$0xff] %vm22_vm0, %v770_v58  ;;  %867 = vst.msk [vmem:[#allocation2 + $0x108] sm:$0xff] %vm22_vm0, %v802_v59  ;;  %v775_v1 = vadd.f32 %v1668_v61, %v93_v56  ;;  %v807_v2 = vadd.f32 %v1700_v62, %v125_v57 }
  0xd0   :  { %v903_v3 = vld [vmem:[#allocation2 + $0x10] sm:$0xff]  ;;  %v530_v6 = vpop.f32.mrf.mxu0  ;;  %v658_v7 = vpop.f32.mrf.mxu1 }
  0xd1   :  { %v935_v5 = vld [vmem:[#allocation2 + $0x110] sm:$0xff]  ;;  %v974_v8 = vmul.f32 %v2064_v60, %v903_v3  ;;  %840 = vst.msk [vmem:[#allocation2 + $0x30] sm:$0xff] %vm22_vm0, %v775_v1  ;;  %872 = vst.msk [vmem:[#allocation2 + $0x130] sm:$0xff] %vm22_vm0, %v807_v2  ;;  %v773_v10 = vadd.f32 %v530_v6, %v91_v63  ;;  %v805_v11 = vadd.f32 %v658_v7, %v123_v0  ;;  %v98_v63 = vld [vmem:[#allocation2 + $0x58] sm:$0xff] }
  0xd2   :  { %v1006_v9 = vmul.f32 %v2064_v60, %v935_v5  ;;  %v901_v14 = vld [vmem:[#allocation2] sm:$0xff]  ;;  %v1669_v16 = vpop.f32.mrf.mxu0  ;;  %v1701_v17 = vpop.f32.mrf.mxu1  ;;  %v130_v0 = vld [vmem:[#allocation2 + $0x158] sm:$0xff]  ;;  %v96_v1 = vld [vmem:[#allocation2 + $0x48] sm:$0xff] }
  0xd3   :  { %v933_v15 = vld [vmem:[#allocation2 + $0x100] sm:$0xff]  ;;  %v1045_v18 = vadd.f32 %v2071_v4, %v974_v8  ;;  %v972_v20 = vmul.f32 %v2064_v60, %v901_v14  ;;  %838 = vst.msk [vmem:[#allocation2 + $0x20] sm:$0xff] %vm22_vm0, %v773_v10  ;;  %870 = vst.msk [vmem:[#allocation2 + $0x120] sm:$0xff] %vm22_vm0, %v805_v11  ;;  %v776_v26 = vadd.f32 %v1669_v16, %v94_v12  ;;  %v128_v11 = vld [vmem:[#allocation2 + $0x148] sm:$0xff] }
  0xd4   :  { %v1077_v19 = vadd.f32 %v2071_v4, %v1006_v9  ;;  %v1004_v21 = vmul.f32 %v2064_v60, %v933_v15  ;;  %v904_v24 = vld [vmem:[#allocation2 + $0x18] sm:$0xff]  ;;  %v808_v27 = vadd.f32 %v1701_v17, %v126_v13  ;;  %v533_v28 = vpop.f32.mrf.mxu0  ;;  %v661_v29 = vpop.f32.mrf.mxu1 }
  0xd5   :  { %v936_v25 = vld [vmem:[#allocation2 + $0x118] sm:$0xff]  ;;  %v1565_v30 = vpack.c.bf16 %v1045_v18, %v1045_v18  ;;  %v1043_v32 = vadd.f32 %v2071_v4, %v972_v20  ;;  %v975_v36 = vmul.f32 %v2064_v60, %v904_v24  ;;  %841 = vst.msk [vmem:[#allocation2 + $0x38] sm:$0xff] %vm22_vm0, %v776_v26  ;;  %v774_v40 = vadd.f32 %v533_v28, %v92_v22  ;;  %v101_v22 = vld [vmem:[#allocation2 + $0x70] sm:$0xff] }
  0xd6   :  { %v1597_v31 = vpack.c.bf16 %v1077_v19, %v1077_v19  ;;  %v1075_v33 = vadd.f32 %v2071_v4, %v1004_v21  ;;  %v1007_v37 = vmul.f32 %v2064_v60, %v936_v25  ;;  %v902_v38 = vld [vmem:[#allocation2 + $0x8] sm:$0xff]  ;;  %873 = vst.msk [vmem:[#allocation2 + $0x138] sm:$0xff] %vm22_vm0, %v808_v27  ;;  %v806_v41 = vadd.f32 %v661_v29, %v124_v23  ;;  %v1672_v42 = vpop.f32.mrf.mxu0  ;;  %v1704_v43 = vpop.f32.mrf.mxu1  ;;  %v133_v23 = vld [vmem:[#allocation2 + $0x170] sm:$0xff] }
  0xd7   :  { %v934_v39 = vld [vmem:[#allocation2 + $0x108] sm:$0xff]  ;;  %1366 = vst.msk [vmem:[%s2511_s4 + $0x8] sm:$0xf] %vm1363_vm2, %v1565_v30  ;;  %v1563_v44 = vpack.c.bf16 %v1043_v32, %v1043_v32  ;;  %v973_v46 = vmul.f32 %v2064_v60, %v902_v38  ;;  %v1046_v50 = vadd.f32 %v2071_v4, %v975_v36  ;;  %v779_v54 = vadd.f32 %v1672_v42, %v97_v34  ;;  %v99_v36 = vld [vmem:[#allocation2 + $0x60] sm:$0xff] }
  0xd8   :  { %1398 = vst.msk [vmem:[%s2511_s4 + $0x88] sm:$0xf] %vm1363_vm2, %v1597_v31  ;;  %v1595_v45 = vpack.c.bf16 %v1075_v33, %v1075_v33  ;;  %v1005_v47 = vmul.f32 %v2064_v60, %v934_v39  ;;  %v1078_v51 = vadd.f32 %v2071_v4, %v1007_v37  ;;  %v907_v52 = vld [vmem:[#allocation2 + $0x30] sm:$0xff]  ;;  %v811_v55 = vadd.f32 %v1704_v43, %v129_v35  ;;  %v546_v56 = vpop.f32.mrf.mxu0  ;;  %v674_v57 = vpop.f32.mrf.mxu1  ;;  %v131_v37 = vld [vmem:[#allocation2 + $0x160] sm:$0xff] }
  0xd9   :  { %v939_v53 = vld [vmem:[#allocation2 + $0x130] sm:$0xff]  ;;  %839 = vst.msk [vmem:[#allocation2 + $0x28] sm:$0xff] %vm22_vm0, %v774_v40  ;;  %871 = vst.msk [vmem:[#allocation2 + $0x128] sm:$0xff] %vm22_vm0, %v806_v41  ;;  %v1044_v58 = vadd.f32 %v2071_v4, %v973_v46  ;;  %v978_v61 = vmul.f32 %v2064_v60, %v907_v52  ;;  %v1566_v2 = vpack.c.bf16 %v1046_v50, %v1046_v50 }
  0xda   :  { %1364 = vst.msk [vmem:[%s2511_s4] sm:$0xf] %vm1363_vm2, %v1563_v44  ;;  %1396 = vst.msk [vmem:[%s2511_s4 + $0x80] sm:$0xf] %vm1363_vm2, %v1595_v45  ;;  %v1076_v59 = vadd.f32 %v2071_v4, %v1005_v47  ;;  %v1010_v62 = vmul.f32 %v2064_v60, %v939_v53  ;;  %v1598_v3 = vpack.c.bf16 %v1078_v51, %v1078_v51  ;;  %v905_v5 = vld [vmem:[#allocation2 + $0x20] sm:$0xff]  ;;  %v1673_v9 = vpop.f32.mrf.mxu0  ;;  %v1705_v10 = vpop.f32.mrf.mxu1 }
  0xdb   :  { %v937_v6 = vld [vmem:[#allocation2 + $0x120] sm:$0xff]  ;;  %844 = vst.msk [vmem:[#allocation2 + $0x50] sm:$0xff] %vm22_vm0, %v779_v54  ;;  %876 = vst.msk [vmem:[#allocation2 + $0x150] sm:$0xff] %vm22_vm0, %v811_v55  ;;  %v777_v7 = vadd.f32 %v546_v56, %v95_v48  ;;  %v809_v8 = vadd.f32 %v674_v57, %v127_v49  ;;  %v1564_v12 = vpack.c.bf16 %v1044_v58, %v1044_v58  ;;  %v102_v48 = vld [vmem:[#allocation2 + $0x78] sm:$0xff] }
  0xdc   :  { %v1596_v13 = vpack.c.bf16 %v1076_v59, %v1076_v59  ;;  %v1049_v14 = vadd.f32 %v2071_v4, %v978_v61  ;;  %v1081_v15 = vadd.f32 %v2071_v4, %v1010_v62  ;;  %1367 = vst.msk [vmem:[%s2511_s4 + $0xc] sm:$0xf] %vm1363_vm2, %v1566_v2  ;;  %1399 = vst.msk [vmem:[%s2511_s4 + $0x8c] sm:$0xf] %vm1363_vm2, %v1598_v3  ;;  %v549_v20 = vpop.f32.mrf.mxu0  ;;  %v677_v21 = vpop.f32.mrf.mxu1  ;;  %v908_v26 = vld [vmem:[#allocation2 + $0x38] sm:$0xff] }
  0xdd   :  { %v976_v16 = vmul.f32 %v2064_v60, %v905_v5  ;;  %v1008_v17 = vmul.f32 %v2064_v60, %v937_v6  ;;  %842 = vst.msk [vmem:[#allocation2 + $0x40] sm:$0xff] %vm22_vm0, %v777_v7  ;;  %874 = vst.msk [vmem:[#allocation2 + $0x140] sm:$0xff] %vm22_vm0, %v809_v8  ;;  %v780_v18 = vadd.f32 %v1673_v9, %v98_v63  ;;  %v940_v27 = vld [vmem:[#allocation2 + $0x138] sm:$0xff]  ;;  %v100_v63 = vld [vmem:[#allocation2 + $0x68] sm:$0xff] }
  0xde   :  { %v812_v19 = vadd.f32 %v1705_v10, %v130_v0  ;;  %1365 = vst.msk [vmem:[%s2511_s4 + $0x4] sm:$0xf] %vm1363_vm2, %v1564_v12  ;;  %1397 = vst.msk [vmem:[%s2511_s4 + $0x84] sm:$0xf] %vm1363_vm2, %v1596_v13  ;;  %v1569_v24 = vpack.c.bf16 %v1049_v14, %v1049_v14  ;;  %v1601_v25 = vpack.c.bf16 %v1081_v15, %v1081_v15  ;;  %v1676_v34 = vpop.f32.mrf.mxu0  ;;  %v1708_v35 = vpop.f32.mrf.mxu1  ;;  %v134_v49 = vld [vmem:[#allocation2 + $0x178] sm:$0xff]  ;;  %v132_v0 = vld [vmem:[#allocation2 + $0x168] sm:$0xff] }
  0xdf   :  { %v778_v28 = vadd.f32 %v549_v20, %v96_v1  ;;  %v810_v29 = vadd.f32 %v677_v21, %v128_v11  ;;  %v1047_v30 = vadd.f32 %v2071_v4, %v976_v16  ;;  %v1079_v31 = vadd.f32 %v2071_v4, %v1008_v17  ;;  %845 = vst.msk [vmem:[#allocation2 + $0x58] sm:$0xff] %vm22_vm0, %v780_v18  ;;  %v105_v14 = vld [vmem:[#allocation2 + $0x90] sm:$0xff] }
  0xe0   :  { %v979_v32 = vmul.f32 %v2064_v60, %v908_v26  ;;  %v1011_v33 = vmul.f32 %v2064_v60, %v940_v27  ;;  %877 = vst.msk [vmem:[#allocation2 + $0x158] sm:$0xff] %vm22_vm0, %v812_v19  ;;  %v906_v38 = vld [vmem:[#allocation2 + $0x28] sm:$0xff]  ;;  %v783_v40 = vadd.f32 %v1676_v34, %v101_v22  ;;  %v815_v41 = vadd.f32 %v1708_v35, %v133_v23  ;;  %v562_v46 = vpop.f32.mrf.mxu0  ;;  %v690_v47 = vpop.f32.mrf.mxu1  ;;  %v137_v21 = vld [vmem:[#allocation2 + $0x190] sm:$0xff]  ;;  %v103_v34 = vld [vmem:[#allocation2 + $0x80] sm:$0xff] }
  0xe1   :  { %1370 = vst.msk [vmem:[%s2511_s4 + $0x18] sm:$0xf] %vm1363_vm2, %v1569_v24  ;;  %1402 = vst.msk [vmem:[%s2511_s4 + $0x98] sm:$0xf] %vm1363_vm2, %v1601_v25  ;;  %v938_v39 = vld [vmem:[#allocation2 + $0x128] sm:$0xff]  ;;  %v1567_v42 = vpack.c.bf16 %v1047_v30, %v1047_v30  ;;  %v1599_v43 = vpack.c.bf16 %v1079_v31, %v1079_v31  ;;  %v977_v50 = vmul.f32 %v2064_v60, %v906_v38  ;;  %v135_v35 = vld [vmem:[#allocation2 + $0x180] sm:$0xff] }
  0xe2   :  { %843 = vst.msk [vmem:[#allocation2 + $0x48] sm:$0xff] %vm22_vm0, %v778_v28  ;;  %875 = vst.msk [vmem:[#allocation2 + $0x148] sm:$0xff] %vm22_vm0, %v810_v29  ;;  %v1050_v44 = vadd.f32 %v2071_v4, %v979_v32  ;;  %v1082_v45 = vadd.f32 %v2071_v4, %v1011_v33  ;;  %v1009_v51 = vmul.f32 %v2064_v60, %v938_v39  ;;  %v911_v52 = vld [vmem:[#allocation2 + $0x50] sm:$0xff]  ;;  %v1677_v61 = vpop.f32.mrf.mxu0  ;;  %v1709_v62 = vpop.f32.mrf.mxu1 }
  0xe3   :  { %v943_v53 = vld [vmem:[#allocation2 + $0x150] sm:$0xff]  ;;  %848 = vst.msk [vmem:[#allocation2 + $0x70] sm:$0xff] %vm22_vm0, %v783_v40  ;;  %880 = vst.msk [vmem:[#allocation2 + $0x170] sm:$0xff] %vm22_vm0, %v815_v41  ;;  %v781_v54 = vadd.f32 %v562_v46, %v99_v36  ;;  %v813_v55 = vadd.f32 %v690_v47, %v131_v37  ;;  %v982_v58 = vmul.f32 %v2064_v60, %v911_v52 }
  0xe4   :  { %1368 = vst.msk [vmem:[%s2511_s4 + $0x10] sm:$0xf] %vm1363_vm2, %v1567_v42  ;;  %1400 = vst.msk [vmem:[%s2511_s4 + $0x90] sm:$0xf] %vm1363_vm2, %v1599_v43  ;;  %v1570_v56 = vpack.c.bf16 %v1050_v44, %v1050_v44  ;;  %v1602_v57 = vpack.c.bf16 %v1082_v45, %v1082_v45  ;;  %v1014_v59 = vmul.f32 %v2064_v60, %v943_v53  ;;  %v909_v3 = vld [vmem:[#allocation2 + $0x40] sm:$0xff]  ;;  %v565_v12 = vpop.f32.mrf.mxu0  ;;  %v693_v13 = vpop.f32.mrf.mxu1 }
  0xe5   :  { %v1048_v1 = vadd.f32 %v2071_v4, %v977_v50  ;;  %v1080_v2 = vadd.f32 %v2071_v4, %v1009_v51  ;;  %v941_v5 = vld [vmem:[#allocation2 + $0x140] sm:$0xff]  ;;  %846 = vst.msk [vmem:[#allocation2 + $0x60] sm:$0xff] %vm22_vm0, %v781_v54  ;;  %878 = vst.msk [vmem:[#allocation2 + $0x160] sm:$0xff] %vm22_vm0, %v813_v55  ;;  %v784_v6 = vadd.f32 %v1677_v61, %v102_v48  ;;  %v106_v48 = vld [vmem:[#allocation2 + $0x98] sm:$0xff] }
  0xe6   :  { %v816_v7 = vadd.f32 %v1709_v62, %v134_v49  ;;  %1371 = vst.msk [vmem:[%s2511_s4 + $0x1c] sm:$0xf] %vm1363_vm2, %v1570_v56  ;;  %1403 = vst.msk [vmem:[%s2511_s4 + $0x9c] sm:$0xf] %vm1363_vm2, %v1602_v57  ;;  %v1053_v8 = vadd.f32 %v2071_v4, %v982_v58  ;;  %v1085_v9 = vadd.f32 %v2071_v4, %v1014_v59  ;;  %v912_v17 = vld [vmem:[#allocation2 + $0x58] sm:$0xff]  ;;  %v1680_v28 = vpop.f32.mrf.mxu0  ;;  %v1712_v29 = vpop.f32.mrf.mxu1 }
  0xe7   :  { %v980_v10 = vmul.f32 %v2064_v60, %v909_v3  ;;  %v1012_v11 = vmul.f32 %v2064_v60, %v941_v5  ;;  %v1568_v15 = vpack.c.bf16 %v1048_v1, %v1048_v1  ;;  %v1600_v16 = vpack.c.bf16 %v1080_v2, %v1080_v2  ;;  %v944_v18 = vld [vmem:[#allocation2 + $0x158] sm:$0xff]  ;;  %849 = vst.msk [vmem:[#allocation2 + $0x78] sm:$0xff] %vm22_vm0, %v784_v6 }
  0xe8   :  { %881 = vst.msk [vmem:[#allocation2 + $0x178] sm:$0xff] %vm22_vm0, %v816_v7  ;;  %v782_v19 = vadd.f32 %v565_v12, %v100_v63  ;;  %v814_v20 = vadd.f32 %v693_v13, %v132_v0  ;;  %v1573_v22 = vpack.c.bf16 %v1053_v8, %v1053_v8  ;;  %v1605_v23 = vpack.c.bf16 %v1085_v9, %v1085_v9  ;;  %v578_v42 = vpop.f32.mrf.mxu0  ;;  %v706_v43 = vpop.f32.mrf.mxu1  ;;  %v138_v56 = vld [vmem:[#allocation2 + $0x198] sm:$0xff]  ;;  %v104_v12 = vld [vmem:[#allocation2 + $0x88] sm:$0xff] }
  0xe9   :  { %v1051_v24 = vadd.f32 %v2071_v4, %v980_v10  ;;  %v1083_v25 = vadd.f32 %v2071_v4, %v1012_v11  ;;  %v910_v26 = vld [vmem:[#allocation2 + $0x48] sm:$0xff]  ;;  %1369 = vst.msk [vmem:[%s2511_s4 + $0x14] sm:$0xf] %vm1363_vm2, %v1568_v15  ;;  %1401 = vst.msk [vmem:[%s2511_s4 + $0x94] sm:$0xf] %vm1363_vm2, %v1600_v16  ;;  %v983_v30 = vmul.f32 %v2064_v60, %v912_v17 }
  0xea   :  { %v942_v27 = vld [vmem:[#allocation2 + $0x148] sm:$0xff]  ;;  %v1015_v31 = vmul.f32 %v2064_v60, %v944_v18  ;;  %v981_v32 = vmul.f32 %v2064_v60, %v910_v26  ;;  %847 = vst.msk [vmem:[#allocation2 + $0x68] sm:$0xff] %vm22_vm0, %v782_v19  ;;  %879 = vst.msk [vmem:[#allocation2 + $0x168] sm:$0xff] %vm22_vm0, %v814_v20  ;;  %v915_v38 = vld [vmem:[#allocation2 + $0x70] sm:$0xff]  ;;  %v787_v40 = vadd.f32 %v1680_v28, %v105_v14  ;;  %v1681_v55 = vpop.f32.mrf.mxu0  ;;  %v1713_v57 = vpop.f32.mrf.mxu1 }
  0xeb   :  { %v1013_v33 = vmul.f32 %v2064_v60, %v942_v27  ;;  %1374 = vst.msk [vmem:[%s2511_s4 + $0x28] sm:$0xf] %vm1363_vm2, %v1573_v22  ;;  %1406 = vst.msk [vmem:[%s2511_s4 + $0xa8] sm:$0xf] %vm1363_vm2, %v1605_v23  ;;  %v1571_v36 = vpack.c.bf16 %v1051_v24, %v1051_v24  ;;  %v1603_v37 = vpack.c.bf16 %v1083_v25, %v1083_v25  ;;  %v947_v39 = vld [vmem:[#allocation2 + $0x170] sm:$0xff]  ;;  %v136_v13 = vld [vmem:[#allocation2 + $0x188] sm:$0xff] }
  0xec   :  { %v819_v41 = vadd.f32 %v1712_v29, %v137_v21  ;;  %v1054_v44 = vadd.f32 %v2071_v4, %v983_v30  ;;  %v1086_v45 = vadd.f32 %v2071_v4, %v1015_v31  ;;  %v1052_v46 = vadd.f32 %v2071_v4, %v981_v32  ;;  %v913_v51 = vld [vmem:[#allocation2 + $0x60] sm:$0xff]  ;;  %852 = vst.msk [vmem:[#allocation2 + $0x90] sm:$0xff] %vm22_vm0, %v787_v40  ;;  %v581_v6 = vpop.f32.mrf.mxu0  ;;  %v709_v7 = vpop.f32.mrf.mxu1  ;;  %v109_v26 = vld [vmem:[#allocation2 + $0xb0] sm:$0xff] }
  0xed   :  { %v1084_v47 = vadd.f32 %v2071_v4, %v1013_v33  ;;  %1372 = vst.msk [vmem:[%s2511_s4 + $0x20] sm:$0xf] %vm1363_vm2, %v1571_v36  ;;  %1404 = vst.msk [vmem:[%s2511_s4 + $0xa0] sm:$0xf] %vm1363_vm2, %v1603_v37  ;;  %v986_v49 = vmul.f32 %v2064_v60, %v915_v38  ;;  %v1018_v50 = vmul.f32 %v2064_v60, %v947_v39  ;;  %v945_v52 = vld [vmem:[#allocation2 + $0x160] sm:$0xff]  ;;  %v141_v27 = vld [vmem:[#allocation2 + $0x1b0] sm:$0xff] }
  0xee   :  { %884 = vst.msk [vmem:[#allocation2 + $0x190] sm:$0xff] %vm22_vm0, %v819_v41  ;;  %v785_v53 = vadd.f32 %v578_v42, %v103_v34  ;;  %v817_v54 = vadd.f32 %v706_v43, %v135_v35  ;;  %v1574_v58 = vpack.c.bf16 %v1054_v44, %v1054_v44  ;;  %v1606_v59 = vpack.c.bf16 %v1086_v45, %v1086_v45  ;;  %v916_v3 = vld [vmem:[#allocation2 + $0x78] sm:$0xff]  ;;  %v1684_v20 = vpop.f32.mrf.mxu0  ;;  %v1716_v21 = vpop.f32.mrf.mxu1  ;;  %v107_v32 = vld [vmem:[#allocation2 + $0xa0] sm:$0xff] }
  0xef   :  { %v1572_v61 = vpack.c.bf16 %v1052_v46, %v1052_v46  ;;  %v1604_v62 = vpack.c.bf16 %v1084_v47, %v1084_v47  ;;  %v1057_v63 = vadd.f32 %v2071_v4, %v986_v49  ;;  %v1089_v0 = vadd.f32 %v2071_v4, %v1018_v50  ;;  %v948_v5 = vld [vmem:[#allocation2 + $0x178] sm:$0xff]  ;;  %v139_v34 = vld [vmem:[#allocation2 + $0x1a0] sm:$0xff]  ;;  %v108_v50 = vld [vmem:[#allocation2 + $0xa8] sm:$0xff] }
  0xf0   :  { %v984_v1 = vmul.f32 %v2064_v60, %v913_v51  ;;  %v1016_v2 = vmul.f32 %v2064_v60, %v945_v52  ;;  %850 = vst.msk [vmem:[#allocation2 + $0x80] sm:$0xff] %vm22_vm0, %v785_v53  ;;  %882 = vst.msk [vmem:[#allocation2 + $0x180] sm:$0xff] %vm22_vm0, %v817_v54  ;;  %v987_v8 = vmul.f32 %v2064_v60, %v916_v3  ;;  %v594_v33 = vpop.f32.mrf.mxu0  ;;  %v722_v35 = vpop.f32.mrf.mxu1  ;;  %v110_v42 = vld [vmem:[#allocation2 + $0xb8] sm:$0xff]  ;;  %v140_v51 = vld [vmem:[#allocation2 + $0x1a8] sm:$0xff] }
  0xf1   :  { %1375 = vst.msk [vmem:[%s2511_s4 + $0x2c] sm:$0xf] %vm1363_vm2, %v1574_v58  ;;  %1407 = vst.msk [vmem:[%s2511_s4 + $0xac] sm:$0xf] %vm1363_vm2, %v1606_v59  ;;  %v1019_v9 = vmul.f32 %v2064_v60, %v948_v5  ;;  %v788_v10 = vadd.f32 %v1681_v55, %v106_v48  ;;  %v820_v11 = vadd.f32 %v1713_v57, %v138_v56  ;;  %v914_v18 = vld [vmem:[#allocation2 + $0x68] sm:$0xff]  ;;  %v142_v48 = vld [vmem:[#allocation2 + $0x1b8] sm:$0xff] }
  0xf2   :  { %1373 = vst.msk [vmem:[%s2511_s4 + $0x24] sm:$0xf] %vm1363_vm2, %v1572_v61  ;;  %1405 = vst.msk [vmem:[%s2511_s4 + $0xa4] sm:$0xf] %vm1363_vm2, %v1604_v62  ;;  %v1577_v14 = vpack.c.bf16 %v1057_v63, %v1057_v63  ;;  %v1609_v15 = vpack.c.bf16 %v1089_v0, %v1089_v0  ;;  %v1055_v16 = vadd.f32 %v2071_v4, %v984_v1  ;;  %v946_v19 = vld [vmem:[#allocation2 + $0x168] sm:$0xff]  ;;  %v1685_v47 = vpop.f32.mrf.mxu0  ;;  %v1717_v49 = vpop.f32.mrf.mxu1  ;;  %v113_v1 = vld [vmem:[#allocation2 + $0xd0] sm:$0xff] }
  0xf3   :  { %v1087_v17 = vadd.f32 %v2071_v4, %v1016_v2  ;;  %v1058_v22 = vadd.f32 %v2071_v4, %v987_v8  ;;  %v1090_v23 = vadd.f32 %v2071_v4, %v1019_v9  ;;  %v985_v24 = vmul.f32 %v2064_v60, %v914_v18  ;;  %853 = vst.msk [vmem:[#allocation2 + $0x98] sm:$0xff] %vm22_vm0, %v788_v10  ;;  %v919_v40 = vld [vmem:[#allocation2 + $0x90] sm:$0xff]  ;;  %v111_v8 = vld [vmem:[#allocation2 + $0xc0] sm:$0xff] }
  0xf4   :  { %v1017_v25 = vmul.f32 %v2064_v60, %v946_v19  ;;  %885 = vst.msk [vmem:[#allocation2 + $0x198] sm:$0xff] %vm22_vm0, %v820_v11  ;;  %v1575_v28 = vpack.c.bf16 %v1055_v16, %v1055_v16  ;;  %v786_v30 = vadd.f32 %v581_v6, %v104_v12  ;;  %v818_v31 = vadd.f32 %v709_v7, %v136_v13  ;;  %v597_v63 = vpop.f32.mrf.mxu0  ;;  %v725_v0 = vpop.f32.mrf.mxu1  ;;  %v145_v2 = vld [vmem:[#allocation2 + $0x1d0] sm:$0xff] }
  0xf5   :  { %1378 = vst.msk [vmem:[%s2511_s4 + $0x38] sm:$0xf] %vm1363_vm2, %v1577_v14  ;;  %1410 = vst.msk [vmem:[%s2511_s4 + $0xb8] sm:$0xf] %vm1363_vm2, %v1609_v15  ;;  %v1607_v29 = vpack.c.bf16 %v1087_v17, %v1087_v17  ;;  %v1578_v36 = vpack.c.bf16 %v1058_v22, %v1058_v22  ;;  %v1610_v37 = vpack.c.bf16 %v1090_v23, %v1090_v23  ;;  %v951_v41 = vld [vmem:[#allocation2 + $0x190] sm:$0xff]  ;;  %v143_v17 = vld [vmem:[#allocation2 + $0x1c0] sm:$0xff] }
  0xf6   :  { %v1056_v38 = vadd.f32 %v2071_v4, %v985_v24  ;;  %v1088_v39 = vadd.f32 %v2071_v4, %v1017_v25  ;;  %1376 = vst.msk [vmem:[%s2511_s4 + $0x30] sm:$0xf] %vm1363_vm2, %v1575_v28  ;;  %v990_v43 = vmul.f32 %v2064_v60, %v919_v40  ;;  %v1022_v44 = vmul.f32 %v2064_v60, %v951_v41  ;;  %v1688_v15 = vpop.f32.mrf.mxu0  ;;  %v1720_v16 = vpop.f32.mrf.mxu1 }
  0xf7   :  { %1408 = vst.msk [vmem:[%s2511_s4 + $0xb0] sm:$0xf] %vm1363_vm2, %v1607_v29  ;;  %v791_v45 = vadd.f32 %v1684_v20, %v109_v26  ;;  %v823_v46 = vadd.f32 %v1716_v21, %v141_v27  ;;  %1379 = vst.msk [vmem:[%s2511_s4 + $0x3c] sm:$0xf] %vm1363_vm2, %v1578_v36  ;;  %v917_v54 = vld [vmem:[#allocation2 + $0x80] sm:$0xff]  ;;  %v789_v56 = vadd.f32 %v594_v33, %v107_v32  ;;  %v114_v26 = vld [vmem:[#allocation2 + $0xd8] sm:$0xff] }
  0xf8   :  { %851 = vst.msk [vmem:[#allocation2 + $0x88] sm:$0xff] %vm22_vm0, %v786_v30  ;;  %883 = vst.msk [vmem:[#allocation2 + $0x188] sm:$0xff] %vm22_vm0, %v818_v31  ;;  %v1576_v52 = vpack.c.bf16 %v1056_v38, %v1056_v38  ;;  %v1608_v53 = vpack.c.bf16 %v1088_v39, %v1088_v39  ;;  %v949_v55 = vld [vmem:[#allocation2 + $0x180] sm:$0xff]  ;;  %v821_v57 = vadd.f32 %v722_v35, %v139_v34  ;;  %v610_v24 = vpop.f32.mrf.mxu0  ;;  %v738_v25 = vpop.f32.mrf.mxu1  ;;  %v146_v27 = vld [vmem:[#allocation2 + $0x1d8] sm:$0xff] }
  0xf9   :  { %1411 = vst.msk [vmem:[%s2511_s4 + $0xbc] sm:$0xf] %vm1363_vm2, %v1610_v37  ;;  %v1061_v58 = vadd.f32 %v2071_v4, %v990_v43  ;;  %v1093_v59 = vadd.f32 %v2071_v4, %v1022_v44  ;;  %v988_v61 = vmul.f32 %v2064_v60, %v917_v54  ;;  %v1020_v62 = vmul.f32 %v2064_v60, %v949_v55  ;;  %v112_v38 = vld [vmem:[#allocation2 + $0xc8] sm:$0xff] }
  0xfa   :  { %856 = vst.msk [vmem:[#allocation2 + $0xb0] sm:$0xff] %vm22_vm0, %v791_v45  ;;  %888 = vst.msk [vmem:[#allocation2 + $0x1b0] sm:$0xff] %vm22_vm0, %v823_v46  ;;  %v792_v3 = vadd.f32 %v1685_v47, %v110_v42  ;;  %v824_v5 = vadd.f32 %v1717_v49, %v142_v48  ;;  %v790_v6 = vadd.f32 %v597_v63, %v108_v50  ;;  %v920_v13 = vld [vmem:[#allocation2 + $0x98] sm:$0xff]  ;;  %v1689_v36 = vpop.f32.mrf.mxu0  ;;  %v1721_v37 = vpop.f32.mrf.mxu1  ;;  %v144_v39 = vld [vmem:[#allocation2 + $0x1c8] sm:$0xff] }
  0xfb   :  { %1377 = vst.msk [vmem:[%s2511_s4 + $0x34] sm:$0xf] %vm1363_vm2, %v1576_v52  ;;  %1409 = vst.msk [vmem:[%s2511_s4 + $0xb4] sm:$0xf] %vm1363_vm2, %v1608_v53  ;;  %v822_v7 = vadd.f32 %v725_v0, %v140_v51  ;;  %v1581_v9 = vpack.c.bf16 %v1061_v58, %v1061_v58  ;;  %v1613_v10 = vpack.c.bf16 %v1093_v59, %v1093_v59  ;;  %v952_v14 = vld [vmem:[#allocation2 + $0x198] sm:$0xff] }
  0xfc   :  { %854 = vst.msk [vmem:[#allocation2 + $0xa0] sm:$0xff] %vm22_vm0, %v789_v56  ;;  %886 = vst.msk [vmem:[#allocation2 + $0x1a0] sm:$0xff] %vm22_vm0, %v821_v57  ;;  %v1059_v11 = vadd.f32 %v2071_v4, %v988_v61  ;;  %v1091_v12 = vadd.f32 %v2071_v4, %v1020_v62  ;;  %v991_v18 = vmul.f32 %v2064_v60, %v920_v13  ;;  %v613_v52 = vpop.f32.mrf.mxu0  ;;  %v741_v53 = vpop.f32.mrf.mxu1 }
  0xfd   :  { %v1023_v19 = vmul.f32 %v2064_v60, %v952_v14  ;;  %857 = vst.msk [vmem:[#allocation2 + $0xb8] sm:$0xff] %vm22_vm0, %v792_v3  ;;  %889 = vst.msk [vmem:[#allocation2 + $0x1b8] sm:$0xff] %vm22_vm0, %v824_v5  ;;  %v795_v20 = vadd.f32 %v1688_v15, %v113_v1  ;;  %v827_v21 = vadd.f32 %v1720_v16, %v145_v2 }
  0xfe   :  { %855 = vst.msk [vmem:[#allocation2 + $0xa8] sm:$0xff] %vm22_vm0, %v790_v6  ;;  %887 = vst.msk [vmem:[#allocation2 + $0x1a8] sm:$0xff] %vm22_vm0, %v822_v7  ;;  %v1579_v22 = vpack.c.bf16 %v1059_v11, %v1059_v11  ;;  %v1611_v23 = vpack.c.bf16 %v1091_v12, %v1091_v12  ;;  %v1062_v28 = vadd.f32 %v2071_v4, %v991_v18  ;;  %v1692_v2 = vpop.f32.mrf.mxu0  ;;  %v1724_v3 = vpop.f32.mrf.mxu1 }
  0xff   :  { %1382 = vst.msk [vmem:[%s2511_s4 + $0x48] sm:$0xf] %vm1363_vm2, %v1581_v9  ;;  %1414 = vst.msk [vmem:[%s2511_s4 + $0xc8] sm:$0xf] %vm1363_vm2, %v1613_v10  ;;  %v1094_v29 = vadd.f32 %v2071_v4, %v1023_v19  ;;  %v918_v30 = vld [vmem:[#allocation2 + $0x88] sm:$0xff]  ;;  %v793_v32 = vadd.f32 %v610_v24, %v111_v8  ;;  %v825_v33 = vadd.f32 %v738_v25, %v143_v17 }
 0x100   :  { %v950_v31 = vld [vmem:[#allocation2 + $0x188] sm:$0xff]  ;;  %860 = vst.msk [vmem:[#allocation2 + $0xd0] sm:$0xff] %vm22_vm0, %v795_v20  ;;  %892 = vst.msk [vmem:[#allocation2 + $0x1d0] sm:$0xff] %vm22_vm0, %v827_v21  ;;  %v989_v34 = vmul.f32 %v2064_v60, %v918_v30  ;;  %v1582_v40 = vpack.c.bf16 %v1062_v28, %v1062_v28  ;;  %v796_v44 = vadd.f32 %v1689_v36, %v114_v26  ;;  %v626_v16 = vpop.f32.mrf.mxu0  ;;  %v754_v17 = vpop.f32.mrf.mxu1 }
 0x101   :  { %1380 = vst.msk [vmem:[%s2511_s4 + $0x40] sm:$0xf] %vm1363_vm2, %v1579_v22  ;;  %1412 = vst.msk [vmem:[%s2511_s4 + $0xc0] sm:$0xf] %vm1363_vm2, %v1611_v23  ;;  %v1021_v35 = vmul.f32 %v2064_v60, %v950_v31  ;;  %v1614_v41 = vpack.c.bf16 %v1094_v29, %v1094_v29  ;;  %v923_v42 = vld [vmem:[#allocation2 + $0xb0] sm:$0xff]  ;;  %v828_v45 = vadd.f32 %v1721_v37, %v146_v27 }
 0x102   :  { %v955_v43 = vld [vmem:[#allocation2 + $0x1b0] sm:$0xff]  ;;  %858 = vst.msk [vmem:[#allocation2 + $0xc0] sm:$0xff] %vm22_vm0, %v793_v32  ;;  %890 = vst.msk [vmem:[#allocation2 + $0x1c0] sm:$0xff] %vm22_vm0, %v825_v33  ;;  %v1060_v46 = vadd.f32 %v2071_v4, %v989_v34  ;;  %v994_v48 = vmul.f32 %v2064_v60, %v923_v42  ;;  %v794_v56 = vadd.f32 %v613_v52, %v112_v38  ;;  %v1693_v34 = vpop.f32.mrf.mxu0 }
 0x103   :  { %v1092_v47 = vadd.f32 %v2071_v4, %v1021_v35  ;;  %v1026_v49 = vmul.f32 %v2064_v60, %v955_v43  ;;  %v921_v50 = vld [vmem:[#allocation2 + $0xa0] sm:$0xff]  ;;  %1383 = vst.msk [vmem:[%s2511_s4 + $0x4c] sm:$0xf] %vm1363_vm2, %v1582_v40  ;;  %1415 = vst.msk [vmem:[%s2511_s4 + $0xcc] sm:$0xf] %vm1363_vm2, %v1614_v41  ;;  %v826_v57 = vadd.f32 %v741_v53, %v144_v39  ;;  %v117_v32 = vld [vmem:[#allocation2 + $0xf0] sm:$0xff]  ;;  %v1725_v35 = vpop.f32.mrf.mxu1 }
 0x104   :  { %v953_v51 = vld [vmem:[#allocation2 + $0x1a0] sm:$0xff]  ;;  %v992_v54 = vmul.f32 %v2064_v60, %v921_v50  ;;  %861 = vst.msk [vmem:[#allocation2 + $0xd8] sm:$0xff] %vm22_vm0, %v796_v44  ;;  %893 = vst.msk [vmem:[#allocation2 + $0x1d8] sm:$0xff] %vm22_vm0, %v828_v45  ;;  %v1580_v58 = vpack.c.bf16 %v1060_v46, %v1060_v46  ;;  %v1065_v61 = vadd.f32 %v2071_v4, %v994_v48  ;;  %v924_v63 = vld [vmem:[#allocation2 + $0xb8] sm:$0xff] }
 0x105   :  { %v1024_v55 = vmul.f32 %v2064_v60, %v953_v51  ;;  %v1612_v59 = vpack.c.bf16 %v1092_v47, %v1092_v47  ;;  %v1097_v62 = vadd.f32 %v2071_v4, %v1026_v49  ;;  %v956_v0 = vld [vmem:[#allocation2 + $0x1b8] sm:$0xff]  ;;  %v922_v1 = vld [vmem:[#allocation2 + $0xa8] sm:$0xff]  ;;  %v995_v7 = vmul.f32 %v2064_v60, %v924_v63  ;;  %859 = vst.msk [vmem:[#allocation2 + $0xc8] sm:$0xff] %vm22_vm0, %v794_v56  ;;  %v149_v33 = vld [vmem:[#allocation2 + $0x1f0] sm:$0xff] }
 0x106   :  { %v1063_v5 = vadd.f32 %v2071_v4, %v992_v54  ;;  %v1027_v8 = vmul.f32 %v2064_v60, %v956_v0  ;;  %v954_v9 = vld [vmem:[#allocation2 + $0x1a8] sm:$0xff]  ;;  %891 = vst.msk [vmem:[#allocation2 + $0x1c8] sm:$0xff] %vm22_vm0, %v826_v57  ;;  %v1585_v10 = vpack.c.bf16 %v1065_v61, %v1065_v61  ;;  %v993_v12 = vmul.f32 %v2064_v60, %v922_v1  ;;  %v115_v46 = vld [vmem:[#allocation2 + $0xe0] sm:$0xff]  ;;  %v118_v48 = vld [vmem:[#allocation2 + $0xf8] sm:$0xff]  ;;  %v757_v0 = vpop.f32.mrf.mxu1 }
 0x107   :  { %v1095_v6 = vadd.f32 %v2071_v4, %v1024_v55  ;;  %1381 = vst.msk [vmem:[%s2511_s4 + $0x44] sm:$0xf] %vm1363_vm2, %v1580_v58  ;;  %1413 = vst.msk [vmem:[%s2511_s4 + $0xc4] sm:$0xf] %vm1363_vm2, %v1612_v59  ;;  %v1617_v11 = vpack.c.bf16 %v1097_v62, %v1097_v62  ;;  %v1025_v13 = vmul.f32 %v2064_v60, %v954_v9  ;;  %v927_v14 = vld [vmem:[#allocation2 + $0xd0] sm:$0xff]  ;;  %v147_v47 = vld [vmem:[#allocation2 + $0x1e0] sm:$0xff]  ;;  %v629_v62 = vpop.f32.mrf.mxu0 }
 0x108   :  { %v959_v15 = vld [vmem:[#allocation2 + $0x1d0] sm:$0xff]  ;;  %v1583_v18 = vpack.c.bf16 %v1063_v5, %v1063_v5  ;;  %v1066_v20 = vadd.f32 %v2071_v4, %v995_v7  ;;  %v1098_v21 = vadd.f32 %v2071_v4, %v1027_v8  ;;  %1386 = vst.msk [vmem:[%s2511_s4 + $0x58] sm:$0xf] %vm1363_vm2, %v1585_v10  ;;  %v1064_v22 = vadd.f32 %v2071_v4, %v993_v12  ;;  %v150_v55 = vld [vmem:[#allocation2 + $0x1f8] sm:$0xff]  ;;  %v116_v61 = vld [vmem:[#allocation2 + $0xe8] sm:$0xff] }
 0x109   :  { %v1615_v19 = vpack.c.bf16 %v1095_v6, %v1095_v6  ;;  %1418 = vst.msk [vmem:[%s2511_s4 + $0xd8] sm:$0xf] %vm1363_vm2, %v1617_v11  ;;  %v1096_v23 = vadd.f32 %v2071_v4, %v1025_v13  ;;  %v998_v24 = vmul.f32 %v2064_v60, %v927_v14  ;;  %v1030_v25 = vmul.f32 %v2064_v60, %v959_v15  ;;  %v925_v26 = vld [vmem:[#allocation2 + $0xc0] sm:$0xff]  ;;  %v148_v63 = vld [vmem:[#allocation2 + $0x1e8] sm:$0xff] }
 0x10a   :  { %v957_v27 = vld [vmem:[#allocation2 + $0x1c0] sm:$0xff]  ;;  %1384 = vst.msk [vmem:[%s2511_s4 + $0x50] sm:$0xf] %vm1363_vm2, %v1583_v18  ;;  %v1586_v28 = vpack.c.bf16 %v1066_v20, %v1066_v20  ;;  %v1618_v29 = vpack.c.bf16 %v1098_v21, %v1098_v21  ;;  %v996_v30 = vmul.f32 %v2064_v60, %v925_v26  ;;  %v1584_v36 = vpack.c.bf16 %v1064_v22, %v1064_v22 }
 0x10b   :  { %1416 = vst.msk [vmem:[%s2511_s4 + $0xd0] sm:$0xf] %vm1363_vm2, %v1615_v19  ;;  %v1028_v31 = vmul.f32 %v2064_v60, %v957_v27  ;;  %v1616_v37 = vpack.c.bf16 %v1096_v23, %v1096_v23  ;;  %v1069_v38 = vadd.f32 %v2071_v4, %v998_v24  ;;  %v1101_v39 = vadd.f32 %v2071_v4, %v1030_v25  ;;  %v928_v40 = vld [vmem:[#allocation2 + $0xd8] sm:$0xff]  ;;  %v1762_v24 = vld [vmem:[%s2509_s2] ss:$0 sm:$0xff] }
 0x10c   :  { %v960_v41 = vld [vmem:[#allocation2 + $0x1d8] sm:$0xff]  ;;  %1387 = vst.msk [vmem:[%s2511_s4 + $0x5c] sm:$0xf] %vm1363_vm2, %v1586_v28  ;;  %1419 = vst.msk [vmem:[%s2511_s4 + $0xdc] sm:$0xf] %vm1363_vm2, %v1618_v29  ;;  %v1067_v42 = vadd.f32 %v2071_v4, %v996_v30  ;;  %v999_v44 = vmul.f32 %v2064_v60, %v928_v40  ;;  %v926_v51 = vld [vmem:[#allocation2 + $0xc8] sm:$0xff]  ;;  %v799_v53 = vadd.f32 %v1692_v2, %v117_v32 }
 0x10d   :  { %v1099_v43 = vadd.f32 %v2071_v4, %v1028_v31  ;;  %v1031_v45 = vmul.f32 %v2064_v60, %v960_v41  ;;  %1385 = vst.msk [vmem:[%s2511_s4 + $0x54] sm:$0xf] %vm1363_vm2, %v1584_v36  ;;  %1417 = vst.msk [vmem:[%s2511_s4 + $0xd4] sm:$0xf] %vm1363_vm2, %v1616_v37  ;;  %v1589_v49 = vpack.c.bf16 %v1069_v38, %v1069_v38  ;;  %v958_v52 = vld [vmem:[#allocation2 + $0x1c8] sm:$0xff] }
 0x10e   :  { %v1621_v50 = vpack.c.bf16 %v1101_v39, %v1101_v39  ;;  %v831_v54 = vadd.f32 %v1724_v3, %v149_v33  ;;  %v1587_v56 = vpack.c.bf16 %v1067_v42, %v1067_v42  ;;  %v1070_v58 = vadd.f32 %v2071_v4, %v999_v44  ;;  %864 = vst.msk [vmem:[#allocation2 + $0xf0] sm:$0xff] %vm22_vm0, %v799_v53 }
 0x10f   :  { %v1619_v57 = vpack.c.bf16 %v1099_v43, %v1099_v43  ;;  %v1102_v59 = vadd.f32 %v2071_v4, %v1031_v45  ;;  %1390 = vst.msk [vmem:[%s2511_s4 + $0x68] sm:$0xf] %vm1363_vm2, %v1589_v49  ;;  %v997_v1 = vmul.f32 %v2064_v60, %v926_v51  ;;  %v1029_v2 = vmul.f32 %v2064_v60, %v958_v52 }
 0x110   :  { %1422 = vst.msk [vmem:[%s2511_s4 + $0xe8] sm:$0xf] %vm1363_vm2, %v1621_v50  ;;  %v797_v3 = vadd.f32 %v626_v16, %v115_v46  ;;  %v829_v5 = vadd.f32 %v754_v17, %v147_v47  ;;  %1388 = vst.msk [vmem:[%s2511_s4 + $0x60] sm:$0xf] %vm1363_vm2, %v1587_v56  ;;  %v1590_v6 = vpack.c.bf16 %v1070_v58, %v1070_v58 }
 0x111   :  { %896 = vst.msk [vmem:[#allocation2 + $0x1f0] sm:$0xff] %vm22_vm0, %v831_v54  ;;  %v1622_v7 = vpack.c.bf16 %v1102_v59, %v1102_v59  ;;  %v800_v8 = vadd.f32 %v1693_v34, %v118_v48  ;;  %v832_v9 = vadd.f32 %v1725_v35, %v150_v55  ;;  %v1068_v10 = vadd.f32 %v2071_v4, %v997_v1  ;;  %v1763_v34 = vld [vmem:[%s2510_s3] ss:$0 sm:$0xff] }
 0x112   :  { %1420 = vst.msk [vmem:[%s2511_s4 + $0xe0] sm:$0xf] %vm1363_vm2, %v1619_v57  ;;  %v1100_v11 = vadd.f32 %v2071_v4, %v1029_v2  ;;  %v798_v12 = vadd.f32 %v629_v62, %v116_v61  ;;  %v830_v13 = vadd.f32 %v757_v0, %v148_v63  ;;  %1391 = vst.msk [vmem:[%s2511_s4 + $0x6c] sm:$0xf] %vm1363_vm2, %v1590_v6 }
 0x113   :  { %862 = vst.msk [vmem:[#allocation2 + $0xe0] sm:$0xff] %vm22_vm0, %v797_v3  ;;  %894 = vst.msk [vmem:[#allocation2 + $0x1e0] sm:$0xff] %vm22_vm0, %v829_v5  ;;  %v1588_v14 = vpack.c.bf16 %v1068_v10, %v1068_v10 }
 0x114   :  { %1423 = vst.msk [vmem:[%s2511_s4 + $0xec] sm:$0xf] %vm1363_vm2, %v1622_v7  ;;  %v1620_v15 = vpack.c.bf16 %v1100_v11, %v1100_v11 }
 0x115   :  { %865 = vst.msk [vmem:[#allocation2 + $0xf8] sm:$0xff] %vm22_vm0, %v800_v8  ;;  %897 = vst.msk [vmem:[#allocation2 + $0x1f8] sm:$0xff] %vm22_vm0, %v832_v9  ;;  %v931_v16 = vld [vmem:[#allocation2 + $0xf0] sm:$0xff] }
 0x116   :  { %863 = vst.msk [vmem:[#allocation2 + $0xe8] sm:$0xff] %vm22_vm0, %v798_v12  ;;  %895 = vst.msk [vmem:[#allocation2 + $0x1e8] sm:$0xff] %vm22_vm0, %v830_v13  ;;  %v1002_v18 = vmul.f32 %v2064_v60, %v931_v16 }
 0x117   :  { %1389 = vst.msk [vmem:[%s2511_s4 + $0x64] sm:$0xf] %vm1363_vm2, %v1588_v14  ;;  %1421 = vst.msk [vmem:[%s2511_s4 + $0xe4] sm:$0xf] %vm1363_vm2, %v1620_v15 }
 0x118   :  { %v963_v17 = vld [vmem:[#allocation2 + $0x1f0] sm:$0xff]  ;;  %v1073_v22 = vadd.f32 %v2071_v4, %v1002_v18 }
 0x119   :  { %v1034_v19 = vmul.f32 %v2064_v60, %v963_v17 }
 0x11a   :  { %v929_v20 = vld [vmem:[#allocation2 + $0xe0] sm:$0xff]  ;;  %v1593_v33 = vpack.c.bf16 %v1073_v22, %v1073_v22 }
 0x11b   :  { %v961_v21 = vld [vmem:[#allocation2 + $0x1e0] sm:$0xff]  ;;  %v1105_v23 = vadd.f32 %v2071_v4, %v1034_v19  ;;  %v1000_v25 = vmul.f32 %v1762_v24, %v929_v20 }
 0x11c   :  { %v1032_v26 = vmul.f32 %v1762_v24, %v961_v21  ;;  %v932_v27 = vld [vmem:[#allocation2 + $0xf8] sm:$0xff]  ;;  %1394 = vst.msk [vmem:[%s2511_s4 + $0x78] sm:$0xf] %vm1363_vm2, %v1593_v33 }
 0x11d   :  { %v964_v28 = vld [vmem:[#allocation2 + $0x1f8] sm:$0xff]  ;;  %v1003_v29 = vmul.f32 %v1762_v24, %v932_v27  ;;  %v930_v31 = vld [vmem:[#allocation2 + $0xe8] sm:$0xff]  ;;  %v1625_v60 = vpack.c.bf16 %v1105_v23, %v1105_v23  ;;  %v1071_v35 = vadd.f32 %v1763_v34, %v1000_v25 }
 0x11e   :  { %v1035_v30 = vmul.f32 %v1762_v24, %v964_v28  ;;  %v962_v32 = vld [vmem:[#allocation2 + $0x1e8] sm:$0xff]  ;;  %v1103_v4 = vadd.f32 %v1763_v34, %v1032_v26  ;;  %v1001_v38 = vmul.f32 %v1762_v24, %v930_v31 }
 0x11f   :  { %v1074_v36 = vadd.f32 %v1763_v34, %v1003_v29  ;;  %v1033_v39 = vmul.f32 %v1762_v24, %v962_v32  ;;  %1426 = vst.msk [vmem:[%s2511_s4 + $0xf8] sm:$0xf] %vm1363_vm2, %v1625_v60  ;;  %v1591_v40 = vpack.c.bf16 %v1071_v35, %v1071_v35 }
 0x120   :  { %v1106_v37 = vadd.f32 %v1763_v34, %v1035_v30  ;;  %v1623_v41 = vpack.c.bf16 %v1103_v4, %v1103_v4  ;;  %v1072_v44 = vadd.f32 %v1763_v34, %v1001_v38 }
 0x121   :  { %v1594_v42 = vpack.c.bf16 %v1074_v36, %v1074_v36  ;;  %v1104_v45 = vadd.f32 %v1763_v34, %v1033_v39  ;;  %1392 = vst.msk [vmem:[%s2511_s4 + $0x70] sm:$0xf] %vm1363_vm2, %v1591_v40 }
 0x122   :  { %v1626_v43 = vpack.c.bf16 %v1106_v37, %v1106_v37  ;;  %1424 = vst.msk [vmem:[%s2511_s4 + $0xf0] sm:$0xf] %vm1363_vm2, %v1623_v41  ;;  %v1592_v46 = vpack.c.bf16 %v1072_v44, %v1072_v44 }
 0x123   :  { %1395 = vst.msk [vmem:[%s2511_s4 + $0x7c] sm:$0xf] %vm1363_vm2, %v1594_v42  ;;  %v1624_v47 = vpack.c.bf16 %v1104_v45, %v1104_v45 }
 0x124   :  { %1427 = vst.msk [vmem:[%s2511_s4 + $0xfc] sm:$0xf] %vm1363_vm2, %v1626_v43  ;;  %1393 = vst.msk [vmem:[%s2511_s4 + $0x74] sm:$0xf] %vm1363_vm2, %v1592_v46 }
 0x125   :  { %1425 = vst.msk [vmem:[%s2511_s4 + $0xf4] sm:$0xf] %vm1363_vm2, %v1624_v47 }

</bundles_post_ra>
